<compile_context>
chip_gen: v7x
topology: tpu7x:2x2x1
jax: 0.10.0
libtpu: 0.0.40
codegen_flags: <defaults>
</compile_context>

<pallas_src>
import jax
import jax.numpy as jnp
from jax import lax
from jax.experimental import pallas as pl
from jax.experimental.pallas import tpu as pltpu

BN_EPS = 1e-5
LANE = 128


def _round_up(n, m):
    return ((n + m - 1) // m) * m


def _pad_axis(a, axis, target):
    pad = target - a.shape[axis]
    if pad <= 0:
        return a
    widths = [(0, 0)] * a.ndim
    widths[axis] = (0, pad)
    return jnp.pad(a, widths)


def _bn_relu(h, gamma, beta):
    # Training-mode BatchNorm1d over the row axis (batch*time), then ReLU.
    # Two-pass (centered) variance for numerical stability; the centered slab
    # is reused for the normalize so the normalize itself costs no extra
    # subtraction.  rsqrt goes to the EUP slot (free vs the VALU work).
    inv_n = 1.0 / h.shape[0]
    mean = jnp.sum(h, axis=0, keepdims=True) * inv_n
    centered = h - mean
    var = jnp.sum(centered * centered, axis=0, keepdims=True) * inv_n
    scale = gamma * lax.rsqrt(var + BN_EPS)
    return jnp.maximum(centered * scale + beta, 0.0)


def _make_kernel(batch, seq_len, layer_num, cmid, pack_taps):
    B, T, L = batch, seq_len, layer_num
    BT = B * T
    bf16 = jnp.bfloat16

    def kernel(x_ref, pre_w_ref, pre_b_ref,
               bn1_g_ref, bn1_b_ref, c1_w_ref, c1_b_ref,
               bn2_g_ref, bn2_b_ref, c2_w_ref, c2_b_ref,
               bn3_g_ref, bn3_b_ref, c3_w_ref, c3_b_ref,
               out_ref):
        # pre: 1x1 conv == matmul over channels (bf16 operands, f32 accumulate).
        h = jnp.dot(x_ref[...].astype(bf16), pre_w_ref[...],
                    preferred_element_type=jnp.float32) + pre_b_ref[...]

        # Row position within its batch element (hoisted out of the loop).
        pos = lax.broadcasted_iota(jnp.int32, (BT, 1), 0) % T

        for l in range(L):
            d = 2 ** l

            # conv1 (1x1 bottleneck down-projection)
            t = _bn_relu(h, bn1_g_ref[l], bn1_b_ref[l])
            t = jnp.dot(t.astype(bf16), c1_w_ref[l],
                        preferred_element_type=jnp.float32) + c1_b_ref[l]

            # conv2 (k=3, dilation=d, padding=d): build x[t-d] / x[t+d] taps
            # with in-register sublane rolls + masks (mask zeroes the rows
            # covered by the conv's zero padding, so nothing wraps across
            # batch boundaries; also handles d >= T by zeroing everything).
            t = _bn_relu(t, bn2_g_ref[l], bn2_b_ref[l])
            left = jnp.where(pos >= d,
                             pltpu.roll(t, shift=d % BT, axis=0),
                             0.0)
            right = jnp.where(pos < T - d,
                              pltpu.roll(t, shift=(BT - d % BT) % BT, axis=0),
                              0.0)
            if pack_taps:
                # 3*cmid <= 128: pack left/center/right into one 128-lane K
                # block at lane offsets 0, cmid, 2*cmid (static lane rolls on
                # the XLU) and hit the MXU with a single (Mp, Mp) matmul.
                packed = (left
                          + pltpu.roll(t, shift=cmid, axis=1)
                          + pltpu.roll(right, shift=2 * cmid, axis=1))
                y = jnp.dot(packed.astype(bf16), c2_w_ref[l],
                            preferred_element_type=jnp.float32) + c2_b_ref[l]
            else:
                # Accumulate three per-tap dots in one f32 accumulator — no
                # (BT, 3*Mp) concat temporary.
                y = (jnp.dot(left.astype(bf16), c2_w_ref[l, 0],
                             preferred_element_type=jnp.float32)
                     + jnp.dot(t.astype(bf16), c2_w_ref[l, 1],
                               preferred_element_type=jnp.float32)
                     + jnp.dot(right.astype(bf16), c2_w_ref[l, 2],
                               preferred_element_type=jnp.float32)
                     + c2_b_ref[l])

            # conv3 (1x1 up-projection) + residual
            t = _bn_relu(y, bn3_g_ref[l], bn3_b_ref[l])
            t = jnp.dot(t.astype(bf16), c3_w_ref[l],
                        preferred_element_type=jnp.float32) + c3_b_ref[l]
            h = h + t

        out_ref[...] = h

    return kernel


def residual_bottleneck_dilated_cnn_bn(x, kp):
    """x: (B, T, input_size) float32; returns (B, T, conditioning_size)."""
    B, T, Cin = x.shape
    Ccond = kp["ccond"]
    cmid = kp["cmid"]
    pack_taps = kp["pack_taps"]
    Cp = kp["pre_w"].shape[1]      # padded conditioning size (multiple of 128)
    Mp = kp["c1_w"].shape[-1]      # padded bottleneck size  (multiple of 128)
    L = kp["bn1_g"].shape[0]
    BT = B * T

    x2 = x.reshape(BT, Cin)
    flat = [x2, kp["pre_w"], kp["pre_b"],
            kp["bn1_g"], kp["bn1_b"], kp["c1_w"], kp["c1_b"],
            kp["bn2_g"], kp["bn2_b"], kp["c2_w"], kp["c2_b"],
            kp["bn3_g"], kp["bn3_b"], kp["c3_w"], kp["c3_b"]]

    # Generation-aware VMEM budget: cap at ~85% of physical VMEM (v7x ~54 MiB
    # of 64, v5e/v6e ~109 MiB of 128), request ~2x the live working set
    # (f32 slab + per-layer temporaries + parameter bytes) within that cap.
    cap = 128 << 20
    try:
        cap = int(getattr(pltpu.get_tpu_info(), "vmem_capacity_bytes", cap))
    except Exception:
        pass
    param_bytes = sum(int(a.size) * a.dtype.itemsize for a in flat)
    work_bytes = 4 * BT * (2 * Cp + 6 * Mp) + param_bytes
    vmem_limit = int(max(32 << 20, min(int(0.85 * cap), 2 * work_bytes)))

    k2 = Mp if pack_taps else 3 * Mp
    cost = pl.CostEstimate(
        flops=2 * BT * (Cin * Cp + L * (Cp * Mp + k2 * Mp + Mp * Cp)),
        transcendentals=L * (Cp + 2 * Mp),
        bytes_accessed=param_bytes + 4 * BT * (Cin + Cp))

    out2 = pl.pallas_call(
        _make_kernel(B, T, L, cmid, pack_taps),
        out_shape=jax.ShapeDtypeStruct((BT, Cp), jnp.float32),
        in_specs=[pl.BlockSpec(memory_space=pltpu.MemorySpace.VMEM)
                  for _ in flat],
        out_specs=pl.BlockSpec(memory_space=pltpu.MemorySpace.VMEM),
        compiler_params=pltpu.CompilerParams(vmem_limit_bytes=vmem_limit),
        cost_estimate=cost,
    )(*flat)
    return out2[:, :Ccond].reshape(B, T, Ccond)


# ---------------- parameter setup (deterministic, PyTorch layouts) ----------

def init_torch_params(key, input_size, layer_num, conditioning_size):
    cmid = conditioning_size // 4
    keys = iter(jax.random.split(key, 32))

    def rnd(shape, scale=0.3):
        return scale * jax.random.normal(next(keys), shape, dtype=jnp.float32)

    return {
        "pre_w": rnd((conditioning_size, input_size, 1)),
        "pre_b": rnd((conditioning_size,)),
        "bn1_g": 1.0 + rnd((layer_num, conditioning_size)),
        "bn1_b": rnd((layer_num, conditioning_size)),
        "c1_w": rnd((layer_num, cmid, conditioning_size, 1)),
        "c1_b": rnd((layer_num, cmid)),
        "bn2_g": 1.0 + rnd((layer_num, cmid)),
        "bn2_b": rnd((layer_num, cmid)),
        "c2_w": rnd((layer_num, cmid, cmid, 3)),
        "c2_b": rnd((layer_num, cmid)),
        "bn3_g": 1.0 + rnd((layer_num, cmid)),
        "bn3_b": rnd((layer_num, cmid)),
        "c3_w": rnd((layer_num, conditioning_size, cmid, 1)),
        "c3_b": rnd((layer_num, conditioning_size)),
    }


def to_kernel_params(tp):
    """Convert PyTorch-layout params to lane-dense, 128-padded kernel params.

    Conv weights are stored as bfloat16 (MXU operand dtype); BN affine params
    and biases stay float32.
    """
    L = tp["bn1_g"].shape[0]
    ccond = tp["pre_w"].shape[0]
    cmid = tp["c1_w"].shape[1]
    Cp = _round_up(ccond, LANE)
    Mp = _round_up(cmid, LANE)
    pack_taps = (3 * cmid) <= LANE
    wdt = jnp.bfloat16

    pre_w = _pad_axis(jnp.transpose(tp["pre_w"][:, :, 0]), 1, Cp).astype(wdt)
    pre_b = _pad_axis(tp["pre_b"], 0, Cp)[None, :]                   # (1, Cp)

    bn1_g = _pad_axis(tp["bn1_g"], 1, Cp)[:, None, :]                # (L,1,Cp)
    bn1_b = _pad_axis(tp["bn1_b"], 1, Cp)[:, None, :]

    c1_w = jnp.transpose(tp["c1_w"][:, :, :, 0], (0, 2, 1))          # (L,Ccond,cmid)
    c1_w = _pad_axis(_pad_axis(c1_w, 1, Cp), 2, Mp).astype(wdt)      # (L,Cp,Mp)
    c1_b = _pad_axis(tp["c1_b"], 1, Mp)[:, None, :]

    bn2_g = _pad_axis(tp["bn2_g"], 1, Mp)[:, None, :]
    bn2_b = _pad_axis(tp["bn2_b"], 1, Mp)[:, None, :]

    # conv2 (L, Cout, Cin, 3): tap k=0 multiplies x[t-d], k=1 x[t], k=2 x[t+d]
    # (matches the kernel's left / center / right ordering).
    taps = jnp.transpose(tp["c2_w"], (0, 3, 2, 1))                   # (L,3,Cin,Cout)
    if pack_taps:
        # One (Mp, Mp) matrix per layer: rows [k*cmid:(k+1)*cmid] hold tap k.
        c2_w = jnp.zeros((L, Mp, Mp), jnp.float32)
        for k in range(3):
            c2_w = c2_w.at[:, k * cmid:(k + 1) * cmid, :cmid].set(taps[:, k])
        c2_w = c2_w.astype(wdt)
    else:
        # One (Mp, Mp) block per tap; the kernel accumulates three dots.
        c2_w = _pad_axis(_pad_axis(taps, 2, Mp), 3, Mp).astype(wdt)  # (L,3,Mp,Mp)
    c2_b = _pad_axis(tp["c2_b"], 1, Mp)[:, None, :]

    bn3_g = _pad_axis(tp["bn3_g"], 1, Mp)[:, None, :]
    bn3_b = _pad_axis(tp["bn3_b"], 1, Mp)[:, None, :]

    c3_w = jnp.transpose(tp["c3_w"][:, :, :, 0], (0, 2, 1))          # (L,cmid,Ccond)
    c3_w = _pad_axis(_pad_axis(c3_w, 1, Mp), 2, Cp).astype(wdt)      # (L,Mp,Cp)
    c3_b = _pad_axis(tp["c3_b"], 1, Cp)[:, None, :]

    return {
        "ccond": ccond, "cmid": cmid, "pack_taps": pack_taps,
        "pre_w": pre_w, "pre_b": pre_b,
        "bn1_g": bn1_g, "bn1_b": bn1_b, "c1_w": c1_w, "c1_b": c1_b,
        "bn2_g": bn2_g, "bn2_b": bn2_b, "c2_w": c2_w, "c2_b": c2_b,
        "bn3_g": bn3_g, "bn3_b": bn3_b, "c3_w": c3_w, "c3_b": c3_b,
    }


# ---------------- pure-JAX reference (mirrors the PyTorch forward) ----------

def torch_reference(x, tp):
    def conv1d(h, w, b, dilation=1, padding=0):
        out = lax.conv_general_dilated(
            h, w, window_strides=(1,), padding=[(padding, padding)],
            rhs_dilation=(dilation,), dimension_numbers=("NCH", "OIH", "NCH"))
        return out + b[None, :, None]

    def bn(h, g, bta):
        mean = jnp.mean(h, axis=(0, 2), keepdims=True)
        var = jnp.mean(jnp.square(h - mean), axis=(0, 2), keepdims=True)
        return ((h - mean) * lax.rsqrt(var + BN_EPS) * g[None, :, None]
                + bta[None, :, None])

    h = jnp.transpose(x, (0, 2, 1))  # (B, C, T), as in x.transpose(1, 2)
    h = conv1d(h, tp["pre_w"], tp["pre_b"])
    L = tp["bn1_g"].shape[0]
    for l in range(L):
        d = 2 ** l
        t = jax.nn.relu(bn(h, tp["bn1_g"][l], tp["bn1_b"][l]))
        t = conv1d(t, tp["c1_w"][l], tp["c1_b"][l])
        t = jax.nn.relu(bn(t, tp["bn2_g"][l], tp["bn2_b"][l]))
        t = conv1d(t, tp["c2_w"][l], tp["c2_b"][l], dilation=d, padding=d)
        t = jax.nn.relu(bn(t, tp["bn3_g"][l], tp["bn3_b"][l]))
        t = conv1d(t, tp["c3_w"][l], tp["c3_b"][l])
        h = h + t
    return jnp.transpose(h, (0, 2, 1))


if __name__ == "__main__":
    B, T = 2, 16
    input_size, layer_num, conditioning_size = 4, 2, 32

    key = jax.random.PRNGKey(0)
    kx, kp = jax.random.split(key)
    x = jax.random.normal(kx, (B, T, input_size), dtype=jnp.float32)
    torch_params = init_torch_params(kp, input_size, layer_num,
                                     conditioning_size)
    kernel_params = to_kernel_params(torch_params)

    out = residual_bottleneck_dilated_cnn_bn(x, kernel_params)
    out = jax.block_until_ready(out)

    ref = torch_reference(x, torch_params)
    assert out.shape == (B, T, conditioning_size)
    max_err = float(jnp.max(jnp.abs(out - ref)))
    rel_err = max_err / max(1.0, float(jnp.max(jnp.abs(ref))))
    # bf16 MXU operands (per perf review) vs the f32 reference: expect a few
    # 1e-3..1e-2 relative; structural bugs would show up as O(1) errors.
    assert rel_err < 3e-2, f"kernel/reference mismatch: abs={max_err} rel={rel_err}"
    print("KERNEL_OK")
</pallas_src>

<mosaic_0001>
module attributes {stable_mosaic.version = 11 : i64} {
  func.func @kernel(%arg0: memref<32x4xf32, #tpu.memory_space<vmem>>, %arg1: memref<4x128xbf16, #tpu.memory_space<vmem>>, %arg2: memref<1x128xf32, #tpu.memory_space<vmem>>, %arg3: memref<2x1x128xf32, #tpu.memory_space<vmem>>, %arg4: memref<2x1x128xf32, #tpu.memory_space<vmem>>, %arg5: memref<2x128x128xbf16, #tpu.memory_space<vmem>>, %arg6: memref<2x1x128xf32, #tpu.memory_space<vmem>>, %arg7: memref<2x1x128xf32, #tpu.memory_space<vmem>>, %arg8: memref<2x1x128xf32, #tpu.memory_space<vmem>>, %arg9: memref<2x128x128xbf16, #tpu.memory_space<vmem>>, %arg10: memref<2x1x128xf32, #tpu.memory_space<vmem>>, %arg11: memref<2x1x128xf32, #tpu.memory_space<vmem>>, %arg12: memref<2x1x128xf32, #tpu.memory_space<vmem>>, %arg13: memref<2x128x128xbf16, #tpu.memory_space<vmem>>, %arg14: memref<2x1x128xf32, #tpu.memory_space<vmem>>, %arg15: memref<32x128xf32, #tpu.memory_space<vmem>>) attributes {dimension_semantics = [], scalar_prefetch = 0 : i64, scratch_operands = 0 : i64, tpu.core_type = #tpu.core_type<tc>} {
    %c0 = arith.constant 0 : index
    %c0_0 = arith.constant 0 : index
    %0 = vector.load %arg0[%c0, %c0_0] : memref<32x4xf32, #tpu.memory_space<vmem>>, vector<32x4xf32>
    %1 = arith.truncf %0 : vector<32x4xf32> to vector<32x4xbf16>
    %c0_1 = arith.constant 0 : index
    %c0_2 = arith.constant 0 : index
    %2 = vector.load %arg1[%c0_1, %c0_2] : memref<4x128xbf16, #tpu.memory_space<vmem>>, vector<4x128xbf16>
    %cst = arith.constant dense<0.000000e+00> : vector<32x128xf32>
    %3 = tpu.matmul %1, %2, %cst {dimension_numbers = #tpu.dot_dimension_numbers<[1], [0], [0], [1], [0, 0, 1, 1], [], []>} : vector<32x4xbf16>, vector<4x128xbf16>, vector<32x128xf32> -> vector<32x128xf32>
    %c0_3 = arith.constant 0 : index
    %c0_4 = arith.constant 0 : index
    %4 = vector.load %arg2[%c0_3, %c0_4] : memref<1x128xf32, #tpu.memory_space<vmem>>, vector<1x128xf32>
    %5 = vector.broadcast %4 : vector<1x128xf32> to vector<32x128xf32>
    %6 = arith.addf %3, %5 : vector<32x128xf32>
    %7 = tpu.iota {dimensions = array<i32: 0>} : vector<32x1xi32>
    %c16_i32 = arith.constant 16 : i32
    %c0_i32 = arith.constant 0 : i32
    %8 = arith.cmpi eq, %c16_i32, %c0_i32 : i32
    %c1_i32 = arith.constant 1 : i32
    %9 = arith.select %8, %c1_i32, %c16_i32 : i32
    %10 = vector.broadcast %9 : i32 to vector<32x1xi32>
    %11 = arith.remsi %7, %10 : vector<32x1xi32>
    %c0_i32_5 = arith.constant 0 : i32
    %12 = vector.broadcast %c0_i32_5 : i32 to vector<32x1xi32>
    %13 = arith.cmpi ne, %11, %12 : vector<32x1xi32>
    %c0_i32_6 = arith.constant 0 : i32
    %14 = vector.broadcast %c0_i32_6 : i32 to vector<32x1xi32>
    %15 = arith.cmpi slt, %11, %14 : vector<32x1xi32>
    %c0_i32_7 = arith.constant 0 : i32
    %16 = arith.cmpi slt, %9, %c0_i32_7 : i32
    %17 = vector.broadcast %16 : i1 to vector<32x1xi1>
    %18 = vector.broadcast %17 : vector<32x1xi1> to vector<32x1xi1>
    %19 = arith.xori %15, %18 : vector<32x1xi1>
    %20 = arith.andi %19, %13 : vector<32x1xi1>
    %21 = vector.broadcast %9 : i32 to vector<32x1xi32>
    %22 = arith.addi %11, %21 : vector<32x1xi32>
    %23 = arith.select %20, %22, %11 : vector<32x1xi1>, vector<32x1xi32>
    %c0_8 = arith.constant 0 : index
    %c0_9 = arith.constant 0 : index
    %c0_10 = arith.constant 0 : index
    %24 = vector.load %arg3[%c0_8, %c0_9, %c0_10] : memref<2x1x128xf32, #tpu.memory_space<vmem>>, vector<1x1x128xf32>
    %25 = vector.shape_cast %24 : vector<1x1x128xf32> to vector<1x128xf32>
    %c0_11 = arith.constant 0 : index
    %c0_12 = arith.constant 0 : index
    %c0_13 = arith.constant 0 : index
    %26 = vector.load %arg4[%c0_11, %c0_12, %c0_13] : memref<2x1x128xf32, #tpu.memory_space<vmem>>, vector<1x1x128xf32>
    %27 = vector.shape_cast %26 : vector<1x1x128xf32> to vector<1x128xf32>
    %cst_14 = arith.constant dense<0.000000e+00> : vector<128xf32>
    %28 = vector.multi_reduction <add>, %6, %cst_14 [0] : vector<32x128xf32> to vector<128xf32>
    %29 = vector.shape_cast %28 : vector<128xf32> to vector<1x128xf32>
    %cst_15 = arith.constant 3.125000e-02 : f32
    %30 = vector.broadcast %cst_15 : f32 to vector<1x128xf32>
    %31 = arith.mulf %29, %30 : vector<1x128xf32>
    %32 = vector.broadcast %31 : vector<1x128xf32> to vector<32x128xf32>
    %33 = arith.subf %6, %32 : vector<32x128xf32>
    %34 = arith.mulf %33, %33 : vector<32x128xf32>
    %cst_16 = arith.constant dense<0.000000e+00> : vector<128xf32>
    %35 = vector.multi_reduction <add>, %34, %cst_16 [0] : vector<32x128xf32> to vector<128xf32>
    %36 = vector.shape_cast %35 : vector<128xf32> to vector<1x128xf32>
    %cst_17 = arith.constant 3.125000e-02 : f32
    %37 = vector.broadcast %cst_17 : f32 to vector<1x128xf32>
    %38 = arith.mulf %36, %37 : vector<1x128xf32>
    %cst_18 = arith.constant 9.99999974E-6 : f32
    %39 = vector.broadcast %cst_18 : f32 to vector<1x128xf32>
    %40 = arith.addf %38, %39 : vector<1x128xf32>
    %41 = math.rsqrt %40 : vector<1x128xf32>
    %42 = arith.mulf %25, %41 : vector<1x128xf32>
    %43 = vector.broadcast %42 : vector<1x128xf32> to vector<32x128xf32>
    %44 = arith.mulf %33, %43 : vector<32x128xf32>
    %45 = vector.broadcast %27 : vector<1x128xf32> to vector<32x128xf32>
    %46 = arith.addf %44, %45 : vector<32x128xf32>
    %cst_19 = arith.constant 0.000000e+00 : f32
    %47 = vector.broadcast %cst_19 : f32 to vector<32x128xf32>
    %48 = arith.maximumf %46, %47 : vector<32x128xf32>
    %49 = arith.truncf %48 : vector<32x128xf32> to vector<32x128xbf16>
    %c0_20 = arith.constant 0 : index
    %c0_21 = arith.constant 0 : index
    %c0_22 = arith.constant 0 : index
    %50 = vector.load %arg5[%c0_20, %c0_21, %c0_22] : memref<2x128x128xbf16, #tpu.memory_space<vmem>>, vector<1x128x128xbf16>
    %51 = vector.shape_cast %50 : vector<1x128x128xbf16> to vector<128x128xbf16>
    %cst_23 = arith.constant dense<0.000000e+00> : vector<32x128xf32>
    %52 = tpu.matmul %49, %51, %cst_23 {dimension_numbers = #tpu.dot_dimension_numbers<[1], [0], [0], [1], [0, 0, 1, 1], [], []>} : vector<32x128xbf16>, vector<128x128xbf16>, vector<32x128xf32> -> vector<32x128xf32>
    %c0_24 = arith.constant 0 : index
    %c0_25 = arith.constant 0 : index
    %c0_26 = arith.constant 0 : index
    %53 = vector.load %arg6[%c0_24, %c0_25, %c0_26] : memref<2x1x128xf32, #tpu.memory_space<vmem>>, vector<1x1x128xf32>
    %54 = vector.shape_cast %53 : vector<1x1x128xf32> to vector<1x128xf32>
    %55 = vector.broadcast %54 : vector<1x128xf32> to vector<32x128xf32>
    %56 = arith.addf %52, %55 : vector<32x128xf32>
    %c0_27 = arith.constant 0 : index
    %c0_28 = arith.constant 0 : index
    %c0_29 = arith.constant 0 : index
    %57 = vector.load %arg7[%c0_27, %c0_28, %c0_29] : memref<2x1x128xf32, #tpu.memory_space<vmem>>, vector<1x1x128xf32>
    %58 = vector.shape_cast %57 : vector<1x1x128xf32> to vector<1x128xf32>
    %c0_30 = arith.constant 0 : index
    %c0_31 = arith.constant 0 : index
    %c0_32 = arith.constant 0 : index
    %59 = vector.load %arg8[%c0_30, %c0_31, %c0_32] : memref<2x1x128xf32, #tpu.memory_space<vmem>>, vector<1x1x128xf32>
    %60 = vector.shape_cast %59 : vector<1x1x128xf32> to vector<1x128xf32>
    %cst_33 = arith.constant dense<0.000000e+00> : vector<128xf32>
    %61 = vector.multi_reduction <add>, %56, %cst_33 [0] : vector<32x128xf32> to vector<128xf32>
    %62 = vector.shape_cast %61 : vector<128xf32> to vector<1x128xf32>
    %cst_34 = arith.constant 3.125000e-02 : f32
    %63 = vector.broadcast %cst_34 : f32 to vector<1x128xf32>
    %64 = arith.mulf %62, %63 : vector<1x128xf32>
    %65 = vector.broadcast %64 : vector<1x128xf32> to vector<32x128xf32>
    %66 = arith.subf %56, %65 : vector<32x128xf32>
    %67 = arith.mulf %66, %66 : vector<32x128xf32>
    %cst_35 = arith.constant dense<0.000000e+00> : vector<128xf32>
    %68 = vector.multi_reduction <add>, %67, %cst_35 [0] : vector<32x128xf32> to vector<128xf32>
    %69 = vector.shape_cast %68 : vector<128xf32> to vector<1x128xf32>
    %cst_36 = arith.constant 3.125000e-02 : f32
    %70 = vector.broadcast %cst_36 : f32 to vector<1x128xf32>
    %71 = arith.mulf %69, %70 : vector<1x128xf32>
    %cst_37 = arith.constant 9.99999974E-6 : f32
    %72 = vector.broadcast %cst_37 : f32 to vector<1x128xf32>
    %73 = arith.addf %71, %72 : vector<1x128xf32>
    %74 = math.rsqrt %73 : vector<1x128xf32>
    %75 = arith.mulf %58, %74 : vector<1x128xf32>
    %76 = vector.broadcast %75 : vector<1x128xf32> to vector<32x128xf32>
    %77 = arith.mulf %66, %76 : vector<32x128xf32>
    %78 = vector.broadcast %60 : vector<1x128xf32> to vector<32x128xf32>
    %79 = arith.addf %77, %78 : vector<32x128xf32>
    %cst_38 = arith.constant 0.000000e+00 : f32
    %80 = vector.broadcast %cst_38 : f32 to vector<32x128xf32>
    %81 = arith.maximumf %79, %80 : vector<32x128xf32>
    %c1_i32_39 = arith.constant 1 : i32
    %82 = vector.broadcast %c1_i32_39 : i32 to vector<32x1xi32>
    %83 = arith.cmpi sge, %23, %82 : vector<32x1xi32>
    %c1_i32_40 = arith.constant 1 : i32
    %84 = tpu.dynamic_rotate %81 by %c1_i32_40 dim 0 : vector<32x128xf32>, i32 -> vector<32x128xf32>
    %cst_41 = arith.constant 0.000000e+00 : f32
    %85 = vector.shape_cast %83 : vector<32x1xi1> to vector<32x1xi1>
    %86 = vector.broadcast %85 : vector<32x1xi1> to vector<32x128xi1>
    %87 = vector.broadcast %cst_41 : f32 to vector<32x128xf32>
    %88 = arith.select %86, %84, %87 : vector<32x128xi1>, vector<32x128xf32>
    %c15_i32 = arith.constant 15 : i32
    %89 = vector.broadcast %c15_i32 : i32 to vector<32x1xi32>
    %90 = arith.cmpi slt, %23, %89 : vector<32x1xi32>
    %c31_i32 = arith.constant 31 : i32
    %91 = tpu.dynamic_rotate %81 by %c31_i32 dim 0 : vector<32x128xf32>, i32 -> vector<32x128xf32>
    %cst_42 = arith.constant 0.000000e+00 : f32
    %92 = vector.shape_cast %90 : vector<32x1xi1> to vector<32x1xi1>
    %93 = vector.broadcast %92 : vector<32x1xi1> to vector<32x128xi1>
    %94 = vector.broadcast %cst_42 : f32 to vector<32x128xf32>
    %95 = arith.select %93, %91, %94 : vector<32x128xi1>, vector<32x128xf32>
    %c8_i32 = arith.constant 8 : i32
    %96 = tpu.dynamic_rotate %81 by %c8_i32 dim 1 : vector<32x128xf32>, i32 -> vector<32x128xf32>
    %97 = arith.addf %88, %96 : vector<32x128xf32>
    %c16_i32_43 = arith.constant 16 : i32
    %98 = tpu.dynamic_rotate %95 by %c16_i32_43 dim 1 : vector<32x128xf32>, i32 -> vector<32x128xf32>
    %99 = arith.addf %97, %98 : vector<32x128xf32>
    %100 = arith.truncf %99 : vector<32x128xf32> to vector<32x128xbf16>
    %c0_44 = arith.constant 0 : index
    %c0_45 = arith.constant 0 : index
    %c0_46 = arith.constant 0 : index
    %101 = vector.load %arg9[%c0_44, %c0_45, %c0_46] : memref<2x128x128xbf16, #tpu.memory_space<vmem>>, vector<1x128x128xbf16>
    %102 = vector.shape_cast %101 : vector<1x128x128xbf16> to vector<128x128xbf16>
    %cst_47 = arith.constant dense<0.000000e+00> : vector<32x128xf32>
    %103 = tpu.matmul %100, %102, %cst_47 {dimension_numbers = #tpu.dot_dimension_numbers<[1], [0], [0], [1], [0, 0, 1, 1], [], []>} : vector<32x128xbf16>, vector<128x128xbf16>, vector<32x128xf32> -> vector<32x128xf32>
    %c0_48 = arith.constant 0 : index
    %c0_49 = arith.constant 0 : index
    %c0_50 = arith.constant 0 : index
    %104 = vector.load %arg10[%c0_48, %c0_49, %c0_50] : memref<2x1x128xf32, #tpu.memory_space<vmem>>, vector<1x1x128xf32>
    %105 = vector.shape_cast %104 : vector<1x1x128xf32> to vector<1x128xf32>
    %106 = vector.broadcast %105 : vector<1x128xf32> to vector<32x128xf32>
    %107 = arith.addf %103, %106 : vector<32x128xf32>
    %c0_51 = arith.constant 0 : index
    %c0_52 = arith.constant 0 : index
    %c0_53 = arith.constant 0 : index
    %108 = vector.load %arg11[%c0_51, %c0_52, %c0_53] : memref<2x1x128xf32, #tpu.memory_space<vmem>>, vector<1x1x128xf32>
    %109 = vector.shape_cast %108 : vector<1x1x128xf32> to vector<1x128xf32>
    %c0_54 = arith.constant 0 : index
    %c0_55 = arith.constant 0 : index
    %c0_56 = arith.constant 0 : index
    %110 = vector.load %arg12[%c0_54, %c0_55, %c0_56] : memref<2x1x128xf32, #tpu.memory_space<vmem>>, vector<1x1x128xf32>
    %111 = vector.shape_cast %110 : vector<1x1x128xf32> to vector<1x128xf32>
    %cst_57 = arith.constant dense<0.000000e+00> : vector<128xf32>
    %112 = vector.multi_reduction <add>, %107, %cst_57 [0] : vector<32x128xf32> to vector<128xf32>
    %113 = vector.shape_cast %112 : vector<128xf32> to vector<1x128xf32>
    %cst_58 = arith.constant 3.125000e-02 : f32
    %114 = vector.broadcast %cst_58 : f32 to vector<1x128xf32>
    %115 = arith.mulf %113, %114 : vector<1x128xf32>
    %116 = vector.broadcast %115 : vector<1x128xf32> to vector<32x128xf32>
    %117 = arith.subf %107, %116 : vector<32x128xf32>
    %118 = arith.mulf %117, %117 : vector<32x128xf32>
    %cst_59 = arith.constant dense<0.000000e+00> : vector<128xf32>
    %119 = vector.multi_reduction <add>, %118, %cst_59 [0] : vector<32x128xf32> to vector<128xf32>
    %120 = vector.shape_cast %119 : vector<128xf32> to vector<1x128xf32>
    %cst_60 = arith.constant 3.125000e-02 : f32
    %121 = vector.broadcast %cst_60 : f32 to vector<1x128xf32>
    %122 = arith.mulf %120, %121 : vector<1x128xf32>
    %cst_61 = arith.constant 9.99999974E-6 : f32
    %123 = vector.broadcast %cst_61 : f32 to vector<1x128xf32>
    %124 = arith.addf %122, %123 : vector<1x128xf32>
    %125 = math.rsqrt %124 : vector<1x128xf32>
    %126 = arith.mulf %109, %125 : vector<1x128xf32>
    %127 = vector.broadcast %126 : vector<1x128xf32> to vector<32x128xf32>
    %128 = arith.mulf %117, %127 : vector<32x128xf32>
    %129 = vector.broadcast %111 : vector<1x128xf32> to vector<32x128xf32>
    %130 = arith.addf %128, %129 : vector<32x128xf32>
    %cst_62 = arith.constant 0.000000e+00 : f32
    %131 = vector.broadcast %cst_62 : f32 to vector<32x128xf32>
    %132 = arith.maximumf %130, %131 : vector<32x128xf32>
    %133 = arith.truncf %132 : vector<32x128xf32> to vector<32x128xbf16>
    %c0_63 = arith.constant 0 : index
    %c0_64 = arith.constant 0 : index
    %c0_65 = arith.constant 0 : index
    %134 = vector.load %arg13[%c0_63, %c0_64, %c0_65] : memref<2x128x128xbf16, #tpu.memory_space<vmem>>, vector<1x128x128xbf16>
    %135 = vector.shape_cast %134 : vector<1x128x128xbf16> to vector<128x128xbf16>
    %cst_66 = arith.constant dense<0.000000e+00> : vector<32x128xf32>
    %136 = tpu.matmul %133, %135, %cst_66 {dimension_numbers = #tpu.dot_dimension_numbers<[1], [0], [0], [1], [0, 0, 1, 1], [], []>} : vector<32x128xbf16>, vector<128x128xbf16>, vector<32x128xf32> -> vector<32x128xf32>
    %c0_67 = arith.constant 0 : index
    %c0_68 = arith.constant 0 : index
    %c0_69 = arith.constant 0 : index
    %137 = vector.load %arg14[%c0_67, %c0_68, %c0_69] : memref<2x1x128xf32, #tpu.memory_space<vmem>>, vector<1x1x128xf32>
    %138 = vector.shape_cast %137 : vector<1x1x128xf32> to vector<1x128xf32>
    %139 = vector.broadcast %138 : vector<1x128xf32> to vector<32x128xf32>
    %140 = arith.addf %136, %139 : vector<32x128xf32>
    %141 = arith.addf %6, %140 : vector<32x128xf32>
    %c1 = arith.constant 1 : index
    %c0_70 = arith.constant 0 : index
    %c0_71 = arith.constant 0 : index
    %142 = vector.load %arg3[%c1, %c0_70, %c0_71] : memref<2x1x128xf32, #tpu.memory_space<vmem>>, vector<1x1x128xf32>
    %143 = vector.shape_cast %142 : vector<1x1x128xf32> to vector<1x128xf32>
    %c1_72 = arith.constant 1 : index
    %c0_73 = arith.constant 0 : index
    %c0_74 = arith.constant 0 : index
    %144 = vector.load %arg4[%c1_72, %c0_73, %c0_74] : memref<2x1x128xf32, #tpu.memory_space<vmem>>, vector<1x1x128xf32>
    %145 = vector.shape_cast %144 : vector<1x1x128xf32> to vector<1x128xf32>
    %cst_75 = arith.constant dense<0.000000e+00> : vector<128xf32>
    %146 = vector.multi_reduction <add>, %141, %cst_75 [0] : vector<32x128xf32> to vector<128xf32>
    %147 = vector.shape_cast %146 : vector<128xf32> to vector<1x128xf32>
    %cst_76 = arith.constant 3.125000e-02 : f32
    %148 = vector.broadcast %cst_76 : f32 to vector<1x128xf32>
    %149 = arith.mulf %147, %148 : vector<1x128xf32>
    %150 = vector.broadcast %149 : vector<1x128xf32> to vector<32x128xf32>
    %151 = arith.subf %141, %150 : vector<32x128xf32>
    %152 = arith.mulf %151, %151 : vector<32x128xf32>
    %cst_77 = arith.constant dense<0.000000e+00> : vector<128xf32>
    %153 = vector.multi_reduction <add>, %152, %cst_77 [0] : vector<32x128xf32> to vector<128xf32>
    %154 = vector.shape_cast %153 : vector<128xf32> to vector<1x128xf32>
    %cst_78 = arith.constant 3.125000e-02 : f32
    %155 = vector.broadcast %cst_78 : f32 to vector<1x128xf32>
    %156 = arith.mulf %154, %155 : vector<1x128xf32>
    %cst_79 = arith.constant 9.99999974E-6 : f32
    %157 = vector.broadcast %cst_79 : f32 to vector<1x128xf32>
    %158 = arith.addf %156, %157 : vector<1x128xf32>
    %159 = math.rsqrt %158 : vector<1x128xf32>
    %160 = arith.mulf %143, %159 : vector<1x128xf32>
    %161 = vector.broadcast %160 : vector<1x128xf32> to vector<32x128xf32>
    %162 = arith.mulf %151, %161 : vector<32x128xf32>
    %163 = vector.broadcast %145 : vector<1x128xf32> to vector<32x128xf32>
    %164 = arith.addf %162, %163 : vector<32x128xf32>
    %cst_80 = arith.constant 0.000000e+00 : f32
    %165 = vector.broadcast %cst_80 : f32 to vector<32x128xf32>
    %166 = arith.maximumf %164, %165 : vector<32x128xf32>
    %167 = arith.truncf %166 : vector<32x128xf32> to vector<32x128xbf16>
    %c1_81 = arith.constant 1 : index
    %c0_82 = arith.constant 0 : index
    %c0_83 = arith.constant 0 : index
    %168 = vector.load %arg5[%c1_81, %c0_82, %c0_83] : memref<2x128x128xbf16, #tpu.memory_space<vmem>>, vector<1x128x128xbf16>
    %169 = vector.shape_cast %168 : vector<1x128x128xbf16> to vector<128x128xbf16>
    %cst_84 = arith.constant dense<0.000000e+00> : vector<32x128xf32>
    %170 = tpu.matmul %167, %169, %cst_84 {dimension_numbers = #tpu.dot_dimension_numbers<[1], [0], [0], [1], [0, 0, 1, 1], [], []>} : vector<32x128xbf16>, vector<128x128xbf16>, vector<32x128xf32> -> vector<32x128xf32>
    %c1_85 = arith.constant 1 : index
    %c0_86 = arith.constant 0 : index
    %c0_87 = arith.constant 0 : index
    %171 = vector.load %arg6[%c1_85, %c0_86, %c0_87] : memref<2x1x128xf32, #tpu.memory_space<vmem>>, vector<1x1x128xf32>
    %172 = vector.shape_cast %171 : vector<1x1x128xf32> to vector<1x128xf32>
    %173 = vector.broadcast %172 : vector<1x128xf32> to vector<32x128xf32>
    %174 = arith.addf %170, %173 : vector<32x128xf32>
    %c1_88 = arith.constant 1 : index
    %c0_89 = arith.constant 0 : index
    %c0_90 = arith.constant 0 : index
    %175 = vector.load %arg7[%c1_88, %c0_89, %c0_90] : memref<2x1x128xf32, #tpu.memory_space<vmem>>, vector<1x1x128xf32>
    %176 = vector.shape_cast %175 : vector<1x1x128xf32> to vector<1x128xf32>
    %c1_91 = arith.constant 1 : index
    %c0_92 = arith.constant 0 : index
    %c0_93 = arith.constant 0 : index
    %177 = vector.load %arg8[%c1_91, %c0_92, %c0_93] : memref<2x1x128xf32, #tpu.memory_space<vmem>>, vector<1x1x128xf32>
    %178 = vector.shape_cast %177 : vector<1x1x128xf32> to vector<1x128xf32>
    %cst_94 = arith.constant dense<0.000000e+00> : vector<128xf32>
    %179 = vector.multi_reduction <add>, %174, %cst_94 [0] : vector<32x128xf32> to vector<128xf32>
    %180 = vector.shape_cast %179 : vector<128xf32> to vector<1x128xf32>
    %cst_95 = arith.constant 3.125000e-02 : f32
    %181 = vector.broadcast %cst_95 : f32 to vector<1x128xf32>
    %182 = arith.mulf %180, %181 : vector<1x128xf32>
    %183 = vector.broadcast %182 : vector<1x128xf32> to vector<32x128xf32>
    %184 = arith.subf %174, %183 : vector<32x128xf32>
    %185 = arith.mulf %184, %184 : vector<32x128xf32>
    %cst_96 = arith.constant dense<0.000000e+00> : vector<128xf32>
    %186 = vector.multi_reduction <add>, %185, %cst_96 [0] : vector<32x128xf32> to vector<128xf32>
    %187 = vector.shape_cast %186 : vector<128xf32> to vector<1x128xf32>
    %cst_97 = arith.constant 3.125000e-02 : f32
    %188 = vector.broadcast %cst_97 : f32 to vector<1x128xf32>
    %189 = arith.mulf %187, %188 : vector<1x128xf32>
    %cst_98 = arith.constant 9.99999974E-6 : f32
    %190 = vector.broadcast %cst_98 : f32 to vector<1x128xf32>
    %191 = arith.addf %189, %190 : vector<1x128xf32>
    %192 = math.rsqrt %191 : vector<1x128xf32>
    %193 = arith.mulf %176, %192 : vector<1x128xf32>
    %194 = vector.broadcast %193 : vector<1x128xf32> to vector<32x128xf32>
    %195 = arith.mulf %184, %194 : vector<32x128xf32>
    %196 = vector.broadcast %178 : vector<1x128xf32> to vector<32x128xf32>
    %197 = arith.addf %195, %196 : vector<32x128xf32>
    %cst_99 = arith.constant 0.000000e+00 : f32
    %198 = vector.broadcast %cst_99 : f32 to vector<32x128xf32>
    %199 = arith.maximumf %197, %198 : vector<32x128xf32>
    %c2_i32 = arith.constant 2 : i32
    %200 = vector.broadcast %c2_i32 : i32 to vector<32x1xi32>
    %201 = arith.cmpi sge, %23, %200 : vector<32x1xi32>
    %c2_i32_100 = arith.constant 2 : i32
    %202 = tpu.dynamic_rotate %199 by %c2_i32_100 dim 0 : vector<32x128xf32>, i32 -> vector<32x128xf32>
    %cst_101 = arith.constant 0.000000e+00 : f32
    %203 = vector.shape_cast %201 : vector<32x1xi1> to vector<32x1xi1>
    %204 = vector.broadcast %203 : vector<32x1xi1> to vector<32x128xi1>
    %205 = vector.broadcast %cst_101 : f32 to vector<32x128xf32>
    %206 = arith.select %204, %202, %205 : vector<32x128xi1>, vector<32x128xf32>
    %c14_i32 = arith.constant 14 : i32
    %207 = vector.broadcast %c14_i32 : i32 to vector<32x1xi32>
    %208 = arith.cmpi slt, %23, %207 : vector<32x1xi32>
    %c30_i32 = arith.constant 30 : i32
    %209 = tpu.dynamic_rotate %199 by %c30_i32 dim 0 : vector<32x128xf32>, i32 -> vector<32x128xf32>
    %cst_102 = arith.constant 0.000000e+00 : f32
    %210 = vector.shape_cast %208 : vector<32x1xi1> to vector<32x1xi1>
    %211 = vector.broadcast %210 : vector<32x1xi1> to vector<32x128xi1>
    %212 = vector.broadcast %cst_102 : f32 to vector<32x128xf32>
    %213 = arith.select %211, %209, %212 : vector<32x128xi1>, vector<32x128xf32>
    %c8_i32_103 = arith.constant 8 : i32
    %214 = tpu.dynamic_rotate %199 by %c8_i32_103 dim 1 : vector<32x128xf32>, i32 -> vector<32x128xf32>
    %215 = arith.addf %206, %214 : vector<32x128xf32>
    %c16_i32_104 = arith.constant 16 : i32
    %216 = tpu.dynamic_rotate %213 by %c16_i32_104 dim 1 : vector<32x128xf32>, i32 -> vector<32x128xf32>
    %217 = arith.addf %215, %216 : vector<32x128xf32>
    %218 = arith.truncf %217 : vector<32x128xf32> to vector<32x128xbf16>
    %c1_105 = arith.constant 1 : index
    %c0_106 = arith.constant 0 : index
    %c0_107 = arith.constant 0 : index
    %219 = vector.load %arg9[%c1_105, %c0_106, %c0_107] : memref<2x128x128xbf16, #tpu.memory_space<vmem>>, vector<1x128x128xbf16>
    %220 = vector.shape_cast %219 : vector<1x128x128xbf16> to vector<128x128xbf16>
    %cst_108 = arith.constant dense<0.000000e+00> : vector<32x128xf32>
    %221 = tpu.matmul %218, %220, %cst_108 {dimension_numbers = #tpu.dot_dimension_numbers<[1], [0], [0], [1], [0, 0, 1, 1], [], []>} : vector<32x128xbf16>, vector<128x128xbf16>, vector<32x128xf32> -> vector<32x128xf32>
    %c1_109 = arith.constant 1 : index
    %c0_110 = arith.constant 0 : index
    %c0_111 = arith.constant 0 : index
    %222 = vector.load %arg10[%c1_109, %c0_110, %c0_111] : memref<2x1x128xf32, #tpu.memory_space<vmem>>, vector<1x1x128xf32>
    %223 = vector.shape_cast %222 : vector<1x1x128xf32> to vector<1x128xf32>
    %224 = vector.broadcast %223 : vector<1x128xf32> to vector<32x128xf32>
    %225 = arith.addf %221, %224 : vector<32x128xf32>
    %c1_112 = arith.constant 1 : index
    %c0_113 = arith.constant 0 : index
    %c0_114 = arith.constant 0 : index
    %226 = vector.load %arg11[%c1_112, %c0_113, %c0_114] : memref<2x1x128xf32, #tpu.memory_space<vmem>>, vector<1x1x128xf32>
    %227 = vector.shape_cast %226 : vector<1x1x128xf32> to vector<1x128xf32>
    %c1_115 = arith.constant 1 : index
    %c0_116 = arith.constant 0 : index
    %c0_117 = arith.constant 0 : index
    %228 = vector.load %arg12[%c1_115, %c0_116, %c0_117] : memref<2x1x128xf32, #tpu.memory_space<vmem>>, vector<1x1x128xf32>
    %229 = vector.shape_cast %228 : vector<1x1x128xf32> to vector<1x128xf32>
    %cst_118 = arith.constant dense<0.000000e+00> : vector<128xf32>
    %230 = vector.multi_reduction <add>, %225, %cst_118 [0] : vector<32x128xf32> to vector<128xf32>
    %231 = vector.shape_cast %230 : vector<128xf32> to vector<1x128xf32>
    %cst_119 = arith.constant 3.125000e-02 : f32
    %232 = vector.broadcast %cst_119 : f32 to vector<1x128xf32>
    %233 = arith.mulf %231, %232 : vector<1x128xf32>
    %234 = vector.broadcast %233 : vector<1x128xf32> to vector<32x128xf32>
    %235 = arith.subf %225, %234 : vector<32x128xf32>
    %236 = arith.mulf %235, %235 : vector<32x128xf32>
    %cst_120 = arith.constant dense<0.000000e+00> : vector<128xf32>
    %237 = vector.multi_reduction <add>, %236, %cst_120 [0] : vector<32x128xf32> to vector<128xf32>
    %238 = vector.shape_cast %237 : vector<128xf32> to vector<1x128xf32>
    %cst_121 = arith.constant 3.125000e-02 : f32
    %239 = vector.broadcast %cst_121 : f32 to vector<1x128xf32>
    %240 = arith.mulf %238, %239 : vector<1x128xf32>
    %cst_122 = arith.constant 9.99999974E-6 : f32
    %241 = vector.broadcast %cst_122 : f32 to vector<1x128xf32>
    %242 = arith.addf %240, %241 : vector<1x128xf32>
    %243 = math.rsqrt %242 : vector<1x128xf32>
    %244 = arith.mulf %227, %243 : vector<1x128xf32>
    %245 = vector.broadcast %244 : vector<1x128xf32> to vector<32x128xf32>
    %246 = arith.mulf %235, %245 : vector<32x128xf32>
    %247 = vector.broadcast %229 : vector<1x128xf32> to vector<32x128xf32>
    %248 = arith.addf %246, %247 : vector<32x128xf32>
    %cst_123 = arith.constant 0.000000e+00 : f32
    %249 = vector.broadcast %cst_123 : f32 to vector<32x128xf32>
    %250 = arith.maximumf %248, %249 : vector<32x128xf32>
    %251 = arith.truncf %250 : vector<32x128xf32> to vector<32x128xbf16>
    %c1_124 = arith.constant 1 : index
    %c0_125 = arith.constant 0 : index
    %c0_126 = arith.constant 0 : index
    %252 = vector.load %arg13[%c1_124, %c0_125, %c0_126] : memref<2x128x128xbf16, #tpu.memory_space<vmem>>, vector<1x128x128xbf16>
    %253 = vector.shape_cast %252 : vector<1x128x128xbf16> to vector<128x128xbf16>
    %cst_127 = arith.constant dense<0.000000e+00> : vector<32x128xf32>
    %254 = tpu.matmul %251, %253, %cst_127 {dimension_numbers = #tpu.dot_dimension_numbers<[1], [0], [0], [1], [0, 0, 1, 1], [], []>} : vector<32x128xbf16>, vector<128x128xbf16>, vector<32x128xf32> -> vector<32x128xf32>
    %c1_128 = arith.constant 1 : index
    %c0_129 = arith.constant 0 : index
    %c0_130 = arith.constant 0 : index
    %255 = vector.load %arg14[%c1_128, %c0_129, %c0_130] : memref<2x1x128xf32, #tpu.memory_space<vmem>>, vector<1x1x128xf32>
    %256 = vector.shape_cast %255 : vector<1x1x128xf32> to vector<1x128xf32>
    %257 = vector.broadcast %256 : vector<1x128xf32> to vector<32x128xf32>
    %258 = arith.addf %254, %257 : vector<32x128xf32>
    %259 = arith.addf %141, %258 : vector<32x128xf32>
    %c0_131 = arith.constant 0 : index
    %c0_132 = arith.constant 0 : index
    %260 = vector.load %arg15[%c0_131, %c0_132] : memref<32x128xf32, #tpu.memory_space<vmem>>, vector<32x128xf32>
    tpu.vector_store %arg15[%c0_131, %c0_132], %259 {strides = array<i32>} : memref<32x128xf32, #tpu.memory_space<vmem>>, vector<32x128xf32>,
    return
  }
}

</mosaic_0001>

<bundles_post_ra>
// kernel: tpu_custom_call.1
= control target key start
LH: loop header
LB: loop body
LE: loop exit
PB: predicated region body
PF: predicated region fallthrough
CT: control target
= control target key end

     0   :  { %20 = vsyncpa [#allocation3], 0  ;;  %s2267_s0 = inlined_call_operand.vmem [shape: f32[32,4], index: 0, kind: input, shape index: {}]   ;;  %s2268_s1 = inlined_call_operand.vmem [shape: bf16[4,128], index: 1, kind: input, shape index: {}]   ;;  %s2269_s2 = inlined_call_operand.vmem [shape: f32[1,128], index: 2, kind: input, shape index: {}]   ;;  %s2270_s3 = inlined_call_operand.vmem [shape: f32[2,1,128], index: 3, kind: input, shape index: {}]   ;;  %s2271_s4 = inlined_call_operand.vmem [shape: f32[2,1,128], index: 4, kind: input, shape index: {}]   ;;  %s2272_s5 = inlined_call_operand.hbm [shape: bf16[2,128,128], index: 5, kind: input, shape index: {}]   ;;  %s2273_s6 = inlined_call_operand.vmem [shape: f32[2,1,128], index: 6, kind: input, shape index: {}]   ;;  %s2274_s7 = inlined_call_operand.vmem [shape: f32[2,1,128], index: 7, kind: input, shape index: {}]   ;;  %s2275_s8 = inlined_call_operand.vmem [shape: f32[2,1,128], index: 8, kind: input, shape index: {}]   ;;  %s2276_s9 = inlined_call_operand.hbm [shape: bf16[2,128,128], index: 9, kind: input, shape index: {}]   ;;  %s2277_s10 = inlined_call_operand.vmem [shape: f32[2,1,128], index: 10, kind: input, shape index: {}]   ;;  %s2278_s11 = inlined_call_operand.vmem [shape: f32[2,1,128], index: 11, kind: input, shape index: {}]   ;;  %s2279_s12 = inlined_call_operand.vmem [shape: f32[2,1,128], index: 12, kind: input, shape index: {}]   ;;  %s2280_s13 = inlined_call_operand.hbm [shape: bf16[2,128,128], index: 13, kind: input, shape index: {}]   ;;  %s2281_s14 = inlined_call_operand.vmem [shape: f32[2,1,128], index: 14, kind: input, shape index: {}]   ;;  %s2282_s15 = inlined_call_operand.hbm [shape: f32[32,128], index: 15, kind: output, shape index: {}]  }
   0x1   :  { %21 = vsyncpa [#allocation6], 0 }
   0x2   :  { %22 = vsyncpa [#allocation4], 0  ;;  %s1909_s18 = smov [#allocation5]   ;;  %s1910_s20 = smov [#allocation2]  }
   0x3   :  { %s56_s19 = sshll.u32 %s1909_s18, 4  ;;  %s38_s21 = sshll.u32 %s1910_s20, 4  ;;  %s57_s19 = int_to_ptr.vmem [resolvable:$true] %s56_s19  ;;  %s1998_s21 = int_to_ptr.vmem [resolvable:$true] %s38_s21 }
   0x4   :  { %s1815_s24 = scalar_lea.hbm %s2276_s9, 2048 }
   0x5   :  { %p1816_p0 = scmp.ne.s32.totalorder %s2276_s9, %s1815_s24  ;;  %p1819_p1 = scmp.lt.u32.totalorder %s1815_s24, %s2276_s9 }
   0x7   :  { %p1821_p2 = pnand %p1819_p1, %p1816_p0 }
   0x9   :  { %1824 = shalt.err (!%p1821_p2)
}
   0xa   :  { %s1825_s29 = scalar_lea.vmem %s57_s19, 2048  ;;  %p1830_p4 = scmp.lt.s32.totalorder %s57_s19, %s57_s19 }
   0xb   :  { %p1826_p3 = scmp.ne.s32.totalorder %s57_s19, %s1825_s29  ;;  %p1831_p5 = scmp.lt.s32.totalorder %s1825_s29, %s1825_s29 }
   0xd   :  { %p1832_p6 = por %p1831_p5, %p1830_p4 }
   0xf   :  { %p1833_p7 = pnand %p1832_p6, %p1826_p3 }
  0x11   :  { %1836 = shalt.err (!%p1833_p7)
}
  0x12   :  { %s1911_s30 = smov 64   ;;  %s1912_s16 = smov 4  }
  0x13   :  { %62 = dma.hbm_to_vmem [thread:$0]  %s2276_s9, 2048, %s57_s19, [#allocation6], %s1911_s30, %s1911_s30, %s1912_s16  }
  0x14   :  { %s1837_s23 = scalar_lea.hbm %s2272_s5, 2048 }
  0x15   :  { %p1838_p8 = scmp.ne.s32.totalorder %s2272_s5, %s1837_s23  ;;  %p1841_p9 = scmp.lt.u32.totalorder %s1837_s23, %s2272_s5 }
  0x17   :  { %p1843_p10 = pnand %p1841_p9, %p1838_p8 }
  0x19   :  { %1846 = shalt.err (!%p1843_p10)
}
  0x1a   :  { %s1847_s28 = scalar_lea.vmem %s1998_s21, 2048  ;;  %p1852_p12 = scmp.lt.s32.totalorder %s1998_s21, %s1998_s21 }
  0x1b   :  { %p1848_p11 = scmp.ne.s32.totalorder %s1998_s21, %s1847_s28  ;;  %p1853_p13 = scmp.lt.s32.totalorder %s1847_s28, %s1847_s28 }
  0x1d   :  { %p1854_p0 = por %p1853_p13, %p1852_p12 }
  0x1f   :  { %p1855_p1 = pnand %p1854_p0, %p1848_p11 }
  0x21   :  { %1858 = shalt.err (!%p1855_p1)
}
  0x22   :  { %44 = dma.hbm_to_vmem [thread:$0]  %s2272_s5, 2048, %s1998_s21, [#allocation3], %s1911_s30, %s1911_s30, %s1912_s16  }
  0x23   :  { %s1913_s29 = smov [#allocation7]   ;;  %s1859_s22 = scalar_lea.hbm %s2280_s13, 2048 }
  0x24   :  { %s74_s17 = sshll.u32 %s1913_s29, 4  ;;  %p1860_p2 = scmp.ne.s32.totalorder %s2280_s13, %s1859_s22  ;;  %s75_s17 = int_to_ptr.vmem [resolvable:$true] %s74_s17 }
  0x25   :  { %p1863_p3 = scmp.lt.u32.totalorder %s1859_s22, %s2280_s13 }
  0x27   :  { %p1865_p4 = pnand %p1863_p3, %p1860_p2 }
  0x29   :  { %1868 = shalt.err (!%p1865_p4)
}
  0x2a   :  { %s1869_s27 = scalar_lea.vmem %s75_s17, 2048  ;;  %p1874_p6 = scmp.lt.s32.totalorder %s75_s17, %s75_s17 }
  0x2b   :  { %p1870_p5 = scmp.ne.s32.totalorder %s75_s17, %s1869_s27  ;;  %p1875_p7 = scmp.lt.s32.totalorder %s1869_s27, %s1869_s27 }
  0x2d   :  { %p1876_p8 = por %p1875_p7, %p1874_p6 }
  0x2f   :  { %p1877_p9 = pnand %p1876_p8, %p1870_p5 }
  0x31   :  { %1880 = shalt.err (!%p1877_p9)
}
  0x32   :  { %80 = dma.hbm_to_vmem [thread:$0]  %s2280_s13, 2048, %s75_s17, [#allocation6], %s1911_s30, %s1911_s30, %s1912_s16  }
  0x33   :  { %1903 = dma.done.wait [#allocation3], 2048  }
  0x34   :  { %1904 = vsyncadd [#allocation3], 4294965248 }
  0x35   :  { %1905 = dma.done.wait [#allocation6], 4096  }
  0x36   :  { %1906 = vsyncadd [#allocation6], 4294963200  ;;  %vm114_vm0 = vcmask 1041408   ;;  %v99_v0 = vld [vmem:[%s2268_s1] sm:$0x3]  ;;  %v94_v2 = vld [vmem:[%s2267_s0 + $0x8] sm:$0xff]  ;;  %v167_v54 = vlaneseq }
  0x37   :  { %v93_v1 = vld [vmem:[%s2267_s0] sm:$0xff]  ;;  %vm107_vm1 = vcmask 31744   ;;  %1745 = vmatprep.subr.msk.bf16.mxu0 %vm114_vm0, %v99_v0  ;;  %v116_v3 = vsel %vm114_vm0, %v99_v0, 0  ;;  %v95_v5 = vld [vmem:[%s2267_s0 + $0x10] sm:$0xff]  ;;  %v96_v6 = vld [vmem:[%s2267_s0 + $0x18] sm:$0xff]  ;;  %s1914_s9 = smov 8  }
  0x38   :  { %v97_v4 = vpack.c.bf16 %v94_v2, %v93_v1  ;;  %1620 = vmatpush3.bf16.msra.mxu0 %v116_v3  ;;  %v98_v7 = vpack.c.bf16 %v96_v6, %v95_v5  ;;  %v1755_v8 = vld [vmem:[#allocation2] sm:$0xff]   ;;  %v1756_v9 = vld [vmem:[#allocation2 + $0x8] sm:$0xff]   ;;  %v1757_v10 = vld [vmem:[#allocation2 + $0x10] sm:$0xff]   ;;  %v2084_v55 = vshrl.u32 %v167_v54, 7  ;;  %s1915_s19 = smov 16  }
  0x39   :  { %1625 = vmatprep.subr.bf16.mxu1 %v1755_v8  ;;  %v1758_v11 = vld [vmem:[#allocation2 + $0x18] sm:$0xff]   ;;  %v1759_v12 = vld [vmem:[#allocation2 + $0x20] sm:$0xff]   ;;  %v1760_v13 = vld [vmem:[#allocation2 + $0x28] sm:$0xff]  }
  0x3a   :  { %1621 = vmatprep.mubr.msk.bf16.mxu0 %vm107_vm1, %v97_v4  ;;  %1626 = vmatpush3.bf16.msra.mxu1 %v1755_v8  ;;  %v1761_v14 = vld [vmem:[#allocation2 + $0x30] sm:$0xff]   ;;  %v1762_v15 = vld [vmem:[#allocation2 + $0x38] sm:$0xff]   ;;  %v1484_v17 = vld [vmem:[%s2269_s2] ss:$0 sm:$0xff]  ;;  %v2090_v57 = vsub.s32 0, %v2084_v55  ;;  %vm489_vm2 = vcmp.lt.s32.totalorder %v2084_v55, 7 }
  0x3b   :  { %1622 = vmatmul.mubr.msk.bf16.vlgmr.msra.gmra.mrb[0].mxu0 %vm107_vm1, %v98_v7  ;;  %1627 = vmatprep.subr.bf16.mxu1 %v1756_v9  ;;  %v220_v56 = vld [vmem:[%s2270_s3] sm:$0x1]  ;;  %vm464_vm3 = vcmp.lt.s32.totalorder %v2084_v55, 1  ;;  %vm1110_vm8 = vcmp.lt.s32.totalorder %v2084_v55, 6  ;;  %vm1085_vm9 = vcmp.lt.s32.totalorder %v2084_v55, 2 }
  0x3c   :  { %v1487_v61 = vld [vmem:[%s2271_s4] ss:$0 sm:$0xff] }
  0x3e   :  { %1628 = vmatpush3.bf16.msra.mxu1 %v1756_v9 }
  0x3f   :  { %1629 = vmatprep.subr.bf16.mxu1 %v1757_v10 }
  0x42   :  { %1630 = vmatpush3.bf16.msra.mxu1 %v1757_v10 }
  0x43   :  { %1631 = vmatprep.subr.bf16.mxu1 %v1758_v11 }
  0x46   :  { %1632 = vmatpush3.bf16.msra.mxu1 %v1758_v11 }
  0x47   :  { %1633 = vmatprep.subr.bf16.mxu1 %v1759_v12 }
  0x4a   :  { %1634 = vmatpush3.bf16.msra.mxu1 %v1759_v12  ;;  %v1763_v12 = vld [vmem:[#allocation5] sm:$0xff]  }
  0x4b   :  { %1635 = vmatprep.subr.bf16.mxu1 %v1760_v13  ;;  %1645 = vmatprep.subr.bf16.mxu0 %v1763_v12 }
  0x4c   :  { %1646 = vmatpush3.bf16.msra.mxu0 %v1763_v12 }
  0x4e   :  { %1636 = vmatpush3.bf16.msra.mxu1 %v1760_v13  ;;  %v1764_v13 = vld [vmem:[#allocation5 + $0x8] sm:$0xff]  }
  0x4f   :  { %1637 = vmatprep.subr.bf16.mxu1 %v1761_v14  ;;  %1647 = vmatprep.subr.bf16.mxu0 %v1764_v13 }
  0x50   :  { %1648 = vmatpush3.bf16.msra.mxu0 %v1764_v13 }
  0x52   :  { %1638 = vmatpush3.bf16.msra.mxu1 %v1761_v14  ;;  %v1765_v14 = vld [vmem:[#allocation5 + $0x10] sm:$0xff]  }
  0x53   :  { %1639 = vmatprep.subr.bf16.mxu1 %v1762_v15  ;;  %1649 = vmatprep.subr.bf16.mxu0 %v1765_v14 }
  0x54   :  { %1650 = vmatpush3.bf16.msra.mxu0 %v1765_v14 }
  0x56   :  { %1640 = vmatpush3.bf16.msra.mxu1 %v1762_v15  ;;  %v1766_v15 = vld [vmem:[#allocation5 + $0x18] sm:$0xff]  }
  0x57   :  { %1651 = vmatprep.subr.bf16.mxu0 %v1766_v15 }
  0x58   :  { %1652 = vmatpush3.bf16.msra.mxu0 %v1766_v15 }
 0x10e   :  { %v1623_v16 = vpop.f32.mrb[0].mxu0 }
 0x10f   :  { %v152_v18 = vpop.f32.mrb[1].mxu0  ;;  %v2072_v23 = vadd.f32 %v1623_v16, %v1484_v17 }
 0x110   :  { %v1624_v19 = vpop.f32.mrb[2].mxu0  ;;  %v2068_v21 = vadd.f32 %v1484_v17, %v152_v18 }
 0x111   :  { %v155_v20 = vpop.f32.mrb[3].mxu0  ;;  %v2076_v25 = vadd.f32 %v1624_v19, %v1484_v17 }
 0x112   :  { %v2070_v22 = vadd.f32 %v1484_v17, %v155_v20  ;;  %v1488_v17 = vld [vmem:[%s2273_s6] ss:$0 sm:$0xff] }
 0x114   :  { %v222_v24 = vadd.f32 %v2070_v22, %v2068_v21 }
 0x116   :  { %v223_v26 = vadd.f32 %v222_v24, %v2072_v23 }
 0x118   :  { %v224_v27 = vadd.f32 %v223_v26, %v2076_v25 }
 0x11a   :  { %v225_v28 = vrot.slane %v224_v27, 4 }
 0x11c   :  { %v226_v29 = vadd.f32 %v225_v28, %v224_v27 }
 0x11e   :  { %v227_v30 = vrot.slane %v226_v29, 2 }
 0x120   :  { %v228_v31 = vadd.f32 %v227_v30, %v226_v29 }
 0x122   :  { %v229_v32 = vrot.slane %v228_v31, 1 }
 0x124   :  { %v230_v33 = vadd.f32 %v229_v32, %v228_v31 }
 0x126   :  { %v231_v34 = vmul.f32 0.03125, %v230_v33 }
 0x128   :  { %v233_v35 = vsub.f32 %v2070_v22, %v231_v34  ;;  %v232_v36 = vsub.f32 %v2068_v21, %v231_v34  ;;  %v234_v37 = vsub.f32 %v2072_v23, %v231_v34  ;;  %v235_v39 = vsub.f32 %v2076_v25, %v231_v34 }
 0x12a   :  { %v237_v38 = vmul.f32 %v233_v35, %v233_v35  ;;  %v236_v40 = vmul.f32 %v232_v36, %v232_v36  ;;  %v238_v41 = vmul.f32 %v234_v37, %v234_v37  ;;  %v239_v43 = vmul.f32 %v235_v39, %v235_v39 }
 0x12c   :  { %v240_v42 = vadd.f32 %v237_v38, %v236_v40 }
 0x12e   :  { %v241_v44 = vadd.f32 %v240_v42, %v238_v41 }
 0x130   :  { %v242_v45 = vadd.f32 %v241_v44, %v239_v43 }
 0x132   :  { %v243_v46 = vrot.slane %v242_v45, 4 }
 0x134   :  { %v244_v47 = vadd.f32 %v243_v46, %v242_v45 }
 0x136   :  { %v245_v48 = vrot.slane %v244_v47, 2 }
 0x138   :  { %v246_v49 = vadd.f32 %v245_v48, %v244_v47 }
 0x13a   :  { %v247_v50 = vrot.slane %v246_v49, 1 }
 0x13c   :  { %v248_v51 = vadd.f32 %v247_v50, %v246_v49 }
 0x13e   :  { %v249_v52 = vmul.f32 0.03125, %v248_v51 }
 0x140   :  { %v250_v53 = vadd.f32 1e-05, %v249_v52 }
 0x142   :  { %1803 = vrsqrt.f32 %v250_v53 }
 0x14c   :  { %v1804_v58 = vpop.eup %1803 }
 0x14d   :  { %v252_v59 = vmul.f32 %v1804_v58, %v220_v56 }
 0x14f   :  { %v257_v60 = vrot.slane %v252_v59, %v2090_v57 }
 0x151   :  { %v259_v62 = vmul.f32 %v257_v60, %v232_v36  ;;  %v260_v63 = vmul.f32 %v257_v60, %v233_v35  ;;  %v261_v0 = vmul.f32 %v257_v60, %v234_v37  ;;  %v262_v1 = vmul.f32 %v257_v60, %v235_v39  ;;  %v1767_v60 = vld [vmem:[#allocation5 + $0x20] sm:$0xff]  }
 0x152   :  { %1653 = vmatprep.subr.bf16.mxu0 %v1767_v60 }
 0x153   :  { %v269_v2 = vadd.f32 %v1487_v61, %v259_v62  ;;  %v270_v3 = vadd.f32 %v1487_v61, %v260_v63  ;;  %v271_v4 = vadd.f32 %v1487_v61, %v261_v0  ;;  %v272_v5 = vadd.f32 %v1487_v61, %v262_v1  ;;  %v399_v61 = vld [vmem:[%s2274_s7] sm:$0x1]  ;;  %1654 = vmatpush3.bf16.msra.mxu0 %v1767_v60  ;;  %v1768_v0 = vld [vmem:[#allocation5 + $0x28] sm:$0xff]  }
 0x154   :  { %1655 = vmatprep.subr.bf16.mxu0 %v1768_v0 }
 0x155   :  { %v273_v6 = vmax.f32 %v269_v2, 0.0  ;;  %v274_v7 = vmax.f32 %v270_v3, 0.0  ;;  %v275_v8 = vmax.f32 %v271_v4, 0.0  ;;  %v276_v9 = vmax.f32 %v272_v5, 0.0  ;;  %v1497_v2 = vld [vmem:[%s2275_s8] ss:$0 sm:$0xff] }
 0x157   :  { %v277_v10 = vpack.c.bf16 %v274_v7, %v273_v6  ;;  %v278_v11 = vpack.c.bf16 %v276_v9, %v275_v8  ;;  %1656 = vmatpush3.bf16.msra.mxu0 %v1768_v0  ;;  %v2107_v7 = vadd.s32 8, %v2084_v55  ;;  %v1769_v8 = vld [vmem:[#allocation5 + $0x30] sm:$0xff]  }
 0x158   :  { %1657 = vmatprep.subr.bf16.mxu0 %v1769_v8 }
 0x159   :  { %1641 = vmatprep.mubr.bf16.mxu1 %v277_v10 }
 0x15a   :  { %1642 = vmatmul.mubr.bf16.vlgmr.msra.gmra.mrb[0].mxu1 %v278_v11 }
 0x15b   :  { %1658 = vmatpush3.bf16.msra.mxu0 %v1769_v8  ;;  %v1774_v8 = vld [vmem:[#allocation7 + $0x18] sm:$0xff]  }
 0x22d   :  { %v1643_v16 = vpop.f32.mrb[0].mxu1 }
 0x22e   :  { %v384_v18 = vpop.f32.mrb[1].mxu1  ;;  %v393_v27 = vadd.f32 %v1643_v16, %v1488_v17 }
 0x22f   :  { %v1644_v19 = vpop.f32.mrb[2].mxu1  ;;  %v385_v24 = vadd.f32 %v1488_v17, %v384_v18  ;;  %v2112_v18 = vadd.s32 24, %v2084_v55 }
 0x230   :  { %v387_v20 = vpop.f32.mrb[3].mxu1  ;;  %v396_v29 = vadd.f32 %v1644_v19, %v1488_v17  ;;  %v1770_v19 = vld [vmem:[#allocation5 + $0x38] sm:$0xff]  }
 0x231   :  { %v388_v26 = vadd.f32 %v1488_v17, %v387_v20  ;;  %v183_v17 = vand.u32 15, %v2107_v7  ;;  %1659 = vmatprep.subr.bf16.mxu0 %v1770_v19 }
 0x232   :  { %1660 = vmatpush3.bf16.msra.mxu0 %v1770_v19 }
 0x233   :  { %v401_v28 = vadd.f32 %v388_v26, %v385_v24  ;;  %vm482_vm4 = vcmp.lt.s32.totalorder %v183_v17, 15  ;;  %vm1103_vm10 = vcmp.lt.s32.totalorder %v183_v17, 14 }
 0x235   :  { %v402_v30 = vadd.f32 %v401_v28, %v393_v27 }
 0x237   :  { %v403_v31 = vadd.f32 %v402_v30, %v396_v29 }
 0x239   :  { %v404_v32 = vrot.slane %v403_v31, 4 }
 0x23b   :  { %v405_v33 = vadd.f32 %v404_v32, %v403_v31 }
 0x23d   :  { %v406_v34 = vrot.slane %v405_v33, 2 }
 0x23f   :  { %v407_v35 = vadd.f32 %v406_v34, %v405_v33 }
 0x241   :  { %v408_v36 = vrot.slane %v407_v35, 1 }
 0x243   :  { %v409_v37 = vadd.f32 %v408_v36, %v407_v35 }
 0x245   :  { %v410_v38 = vmul.f32 0.03125, %v409_v37 }
 0x247   :  { %v411_v39 = vsub.f32 %v385_v24, %v410_v38  ;;  %v412_v40 = vsub.f32 %v388_v26, %v410_v38  ;;  %v413_v41 = vsub.f32 %v393_v27, %v410_v38  ;;  %v414_v42 = vsub.f32 %v396_v29, %v410_v38 }
 0x248   :  { %v197_v38 = vand.u32 15, %v2112_v18 }
 0x249   :  { %v415_v43 = vmul.f32 %v411_v39, %v411_v39  ;;  %v416_v44 = vmul.f32 %v412_v40, %v412_v40  ;;  %v417_v45 = vmul.f32 %v413_v41, %v413_v41  ;;  %v418_v47 = vmul.f32 %v414_v42, %v414_v42 }
 0x24a   :  { %vm484_vm5 = vcmp.lt.s32.totalorder %v197_v38, 15  ;;  %vm1105_vm11 = vcmp.lt.s32.totalorder %v197_v38, 14 }
 0x24b   :  { %v419_v46 = vadd.f32 %v416_v44, %v415_v43  ;;  %v2145_v43 = vadd.s32 16, %v2084_v55  ;;  %v176_v44 = vand.u32 15, %v2084_v55 }
 0x24d   :  { %v420_v48 = vadd.f32 %v419_v46, %v417_v45  ;;  %vm456_vm6 = vcmp.ge.s32.totalorder %v176_v44, 1  ;;  %vm1077_vm12 = vcmp.ge.s32.totalorder %v176_v44, 2 }
 0x24f   :  { %v421_v49 = vadd.f32 %v420_v48, %v418_v47  ;;  %v190_v47 = vand.u32 15, %v2145_v43  ;;  %v1796_v43 = vld [vmem:[#allocation7 + $0x48] sm:$0xff]  }
 0x251   :  { %v422_v50 = vrot.slane %v421_v49, 4  ;;  %vm458_vm7 = vcmp.ge.s32.totalorder %v190_v47, 1  ;;  %vm1079_vm13 = vcmp.ge.s32.totalorder %v190_v47, 2  ;;  %v1797_v47 = vld [vmem:[#allocation7 + $0x50] sm:$0xff]  }
 0x253   :  { %v423_v51 = vadd.f32 %v422_v50, %v421_v49 }
 0x255   :  { %v424_v52 = vrot.slane %v423_v51, 2 }
 0x257   :  { %v425_v53 = vadd.f32 %v424_v52, %v423_v51 }
 0x259   :  { %v426_v54 = vrot.slane %v425_v53, 1 }
 0x25b   :  { %v427_v56 = vadd.f32 %v426_v54, %v425_v53 }
 0x25d   :  { %v428_v58 = vmul.f32 0.03125, %v427_v56 }
 0x25f   :  { %v429_v59 = vadd.f32 1e-05, %v428_v58 }
 0x261   :  { %1805 = vrsqrt.f32 %v429_v59 }
 0x26b   :  { %v1806_v62 = vpop.eup %1805 }
 0x26c   :  { %v431_v63 = vmul.f32 %v1806_v62, %v399_v61 }
 0x26e   :  { %v436_v1 = vrot.slane %v431_v63, %v2090_v57 }
 0x270   :  { %v439_v3 = vmul.f32 %v436_v1, %v412_v40  ;;  %v440_v4 = vmul.f32 %v436_v1, %v413_v41  ;;  %v438_v5 = vmul.f32 %v436_v1, %v411_v39  ;;  %v441_v6 = vmul.f32 %v436_v1, %v414_v42 }
 0x272   :  { %v450_v9 = vadd.f32 %v1497_v2, %v440_v4  ;;  %v448_v10 = vadd.f32 %v1497_v2, %v438_v5  ;;  %v451_v11 = vadd.f32 %v1497_v2, %v441_v6  ;;  %v449_v12 = vadd.f32 %v1497_v2, %v439_v3  ;;  %v1771_v4 = vld [vmem:[#allocation7] sm:$0xff]   ;;  %v1772_v5 = vld [vmem:[#allocation7 + $0x8] sm:$0xff]   ;;  %v1773_v6 = vld [vmem:[#allocation7 + $0x10] sm:$0xff]  }
 0x273   :  { %1665 = vmatprep.subr.bf16.mxu1 %v1771_v4 }
 0x274   :  { %v454_v13 = vmax.f32 %v450_v9, 0.0  ;;  %v452_v14 = vmax.f32 %v448_v10, 0.0  ;;  %v455_v15 = vmax.f32 %v451_v11, 0.0  ;;  %v453_v16 = vmax.f32 %v449_v12, 0.0  ;;  %1666 = vmatpush3.bf16.msra.mxu1 %v1771_v4  ;;  %v1775_v9 = vld [vmem:[#allocation7 + $0x20] sm:$0xff]   ;;  %v1776_v10 = vld [vmem:[#allocation7 + $0x28] sm:$0xff]  }
 0x275   :  { %1667 = vmatprep.subr.bf16.mxu1 %v1772_v5  ;;  %v1777_v11 = vld [vmem:[#allocation7 + $0x30] sm:$0xff]   ;;  %v1778_v12 = vld [vmem:[#allocation7 + $0x38] sm:$0xff]  }
 0x276   :  { %510 = vrot.lane.b32.xlu1 %v454_v13, %s1914_s9  ;;  %506 = vrot.lane.b32.xlu0 %v452_v14, %s1914_s9  ;;  %v486_v20 = vrot.slane %v453_v16, 1  ;;  %v487_v24 = vrot.slane %v454_v13, 1  ;;  %v485_v26 = vrot.slane %v452_v14, 1  ;;  %v488_v27 = vrot.slane %v455_v15, 1 }
 0x277   :  { %v461_v28 = vrot.slane %v453_v16, 7  ;;  %v462_v29 = vrot.slane %v454_v13, 7  ;;  %v463_v30 = vrot.slane %v455_v15, 7  ;;  %v460_v31 = vrot.slane %v452_v14, 7  ;;  %v1498_v14 = vld [vmem:[%s2277_s10] ss:$0 sm:$0xff] }
 0x278   :  { %v491_v32 = vsel %vm489_vm2, %v486_v20, %v487_v24  ;;  %v492_v33 = vsel %vm489_vm2, %v485_v26, %v486_v20  ;;  %v493_v34 = vsel %vm489_vm2, %v488_v27, %v485_v26  ;;  %v490_v35 = vsel %vm489_vm2, %v487_v24, %v488_v27  ;;  %1668 = vmatpush3.bf16.msra.mxu1 %v1772_v5 }
 0x279   :  { %v466_v36 = vsel %vm464_vm3, %v461_v28, %v462_v29  ;;  %v468_v37 = vsel %vm464_vm3, %v463_v30, %v460_v31  ;;  %v465_v39 = vsel %vm464_vm3, %v462_v29, %v463_v30  ;;  %v467_v40 = vsel %vm464_vm3, %v460_v31, %v461_v28  ;;  %1669 = vmatprep.subr.bf16.mxu1 %v1773_v6 }
 0x27a   :  { %512 = vrot.lane.b32.xlu1 %v455_v15, %s1914_s9  ;;  %508 = vrot.lane.b32.xlu0 %v453_v16, %s1914_s9  ;;  %v503_v41 = vsel %vm482_vm4, %v491_v32, 0.0  ;;  %v505_v42 = vsel %vm484_vm5, %v493_v34, 0.0  ;;  %v477_v50 = vsel %vm456_vm6, %v468_v37, 0.0  ;;  %v479_v59 = vsel %vm458_vm7, %v466_v36, 0.0 }
 0x27c   :  { %1670 = vmatpush3.bf16.msra.mxu1 %v1773_v6 }
 0x27d   :  { %1671 = vmatprep.subr.bf16.mxu1 %v1774_v8 }
 0x27e   :  { %520 = vrot.lane.b32.xlu1 %v503_v41, %s1915_s19  ;;  %518 = vrot.lane.b32.xlu0 %v492_v33, %s1915_s19 }
 0x280   :  { %1672 = vmatpush3.bf16.msra.mxu1 %v1774_v8 }
 0x281   :  { %1673 = vmatprep.subr.bf16.mxu1 %v1775_v9 }
 0x282   :  { %524 = vrot.lane.b32.xlu1 %v505_v42, %s1915_s19  ;;  %522 = vrot.lane.b32.xlu0 %v490_v35, %s1915_s19 }
 0x284   :  { %1674 = vmatpush3.bf16.msra.mxu1 %v1775_v9 }
 0x285   :  { %1675 = vmatprep.subr.bf16.mxu1 %v1776_v10 }
 0x288   :  { %1676 = vmatpush3.bf16.msra.mxu1 %v1776_v10 }
 0x289   :  { %1677 = vmatprep.subr.bf16.mxu1 %v1777_v11 }
 0x28c   :  { %1678 = vmatpush3.bf16.msra.mxu1 %v1777_v11 }
 0x28d   :  { %1679 = vmatprep.subr.bf16.mxu1 %v1778_v12 }
 0x290   :  { %1680 = vmatpush3.bf16.msra.mxu1 %v1778_v12 }
 0x2e8   :  { %v511_v45 = vpop.permute.xlu1 %510  ;;  %v507_v46 = vpop.permute.xlu0 %506 }
 0x2e9   :  { %v514_v51 = vadd.f32 %v507_v46, %v477_v50  ;;  %v516_v60 = vadd.f32 %v511_v45, %v479_v59 }
 0x2ec   :  { %v513_v48 = vpop.permute.xlu1 %512  ;;  %v509_v49 = vpop.permute.xlu0 %508 }
 0x2ed   :  { %v515_v52 = vadd.f32 %v509_v49, %v467_v40  ;;  %v517_v61 = vadd.f32 %v513_v48, %v465_v39 }
 0x2f0   :  { %v521_v53 = vpop.permute.xlu1 %520  ;;  %v519_v54 = vpop.permute.xlu0 %518 }
 0x2f1   :  { %v527_v56 = vadd.f32 %v521_v53, %v515_v52  ;;  %v526_v58 = vadd.f32 %v519_v54, %v514_v51 }
 0x2f3   :  { %v530_v62 = vpack.c.bf16 %v527_v56, %v526_v58 }
 0x2f4   :  { %v525_v63 = vpop.permute.xlu1 %524  ;;  %v523_v0 = vpop.permute.xlu0 %522 }
 0x2f5   :  { %v529_v1 = vadd.f32 %v525_v63, %v517_v61  ;;  %v528_v2 = vadd.f32 %v523_v0, %v516_v60  ;;  %1661 = vmatprep.mubr.bf16.mxu0 %v530_v62  ;;  %v652_v63 = vld [vmem:[%s2278_s11] sm:$0x1] }
 0x2f7   :  { %v531_v3 = vpack.c.bf16 %v529_v1, %v528_v2 }
 0x2f9   :  { %1662 = vmatmul.mubr.bf16.vlgmr.msra.gmra.mrb[4].mxu0 %v531_v3  ;;  %v1507_v3 = vld [vmem:[%s2279_s12] ss:$0 sm:$0xff] }
 0x3cc   :  { %v1663_v13 = vpop.f32.mrb[4].mxu0 }
 0x3cd   :  { %v637_v15 = vpop.f32.mrb[5].mxu0  ;;  %v646_v26 = vadd.f32 %v1663_v13, %v1498_v14 }
 0x3ce   :  { %v1664_v16 = vpop.f32.mrb[6].mxu0  ;;  %v638_v20 = vadd.f32 %v1498_v14, %v637_v15 }
 0x3cf   :  { %v640_v19 = vpop.f32.mrb[7].mxu0  ;;  %v649_v28 = vadd.f32 %v1664_v16, %v1498_v14 }
 0x3d0   :  { %v641_v24 = vadd.f32 %v1498_v14, %v640_v19 }
 0x3d2   :  { %v654_v27 = vadd.f32 %v641_v24, %v638_v20 }
 0x3d4   :  { %v655_v29 = vadd.f32 %v654_v27, %v646_v26  ;;  %v1781_v27 = vld [vmem:[#allocation2 + $0x50] sm:$0xff]  }
 0x3d6   :  { %v656_v30 = vadd.f32 %v655_v29, %v649_v28  ;;  %v1783_v29 = vld [vmem:[#allocation2 + $0x60] sm:$0xff]  }
 0x3d8   :  { %v657_v31 = vrot.slane %v656_v30, 4 }
 0x3da   :  { %v658_v32 = vadd.f32 %v657_v31, %v656_v30  ;;  %v1784_v30 = vld [vmem:[#allocation2 + $0x68] sm:$0xff]   ;;  %v1785_v31 = vld [vmem:[#allocation2 + $0x70] sm:$0xff]  }
 0x3dc   :  { %v659_v33 = vrot.slane %v658_v32, 2 }
 0x3de   :  { %v660_v34 = vadd.f32 %v659_v33, %v658_v32  ;;  %v1786_v32 = vld [vmem:[#allocation2 + $0x78] sm:$0xff]   ;;  %v1508_v33 = vld [vmem:[%s2281_s14] ss:$0 sm:$0xff] }
 0x3e0   :  { %v661_v35 = vrot.slane %v660_v34, 1 }
 0x3e2   :  { %v662_v36 = vadd.f32 %v661_v35, %v660_v34 }
 0x3e4   :  { %v663_v37 = vmul.f32 0.03125, %v662_v36 }
 0x3e6   :  { %v664_v39 = vsub.f32 %v638_v20, %v663_v37  ;;  %v665_v40 = vsub.f32 %v641_v24, %v663_v37  ;;  %v666_v41 = vsub.f32 %v646_v26, %v663_v37  ;;  %v667_v42 = vsub.f32 %v649_v28, %v663_v37  ;;  %v1779_v24 = vld [vmem:[#allocation2 + $0x40] sm:$0xff]   ;;  %v1780_v26 = vld [vmem:[#allocation2 + $0x48] sm:$0xff]   ;;  %v1782_v28 = vld [vmem:[#allocation2 + $0x58] sm:$0xff]  }
 0x3e7   :  { %1685 = vmatprep.subr.bf16.mxu0 %v1779_v24 }
 0x3e8   :  { %v668_v45 = vmul.f32 %v664_v39, %v664_v39  ;;  %v669_v46 = vmul.f32 %v665_v40, %v665_v40  ;;  %v670_v48 = vmul.f32 %v666_v41, %v666_v41  ;;  %v671_v50 = vmul.f32 %v667_v42, %v667_v42  ;;  %1686 = vmatpush3.bf16.msra.mxu0 %v1779_v24 }
 0x3e9   :  { %1687 = vmatprep.subr.bf16.mxu0 %v1780_v26 }
 0x3ea   :  { %v672_v49 = vadd.f32 %v669_v46, %v668_v45 }
 0x3ec   :  { %v673_v51 = vadd.f32 %v672_v49, %v670_v48  ;;  %1688 = vmatpush3.bf16.msra.mxu0 %v1780_v26 }
 0x3ed   :  { %1689 = vmatprep.subr.bf16.mxu0 %v1781_v27 }
 0x3ee   :  { %v674_v52 = vadd.f32 %v673_v51, %v671_v50 }
 0x3f0   :  { %v675_v53 = vrot.slane %v674_v52, 4  ;;  %1690 = vmatpush3.bf16.msra.mxu0 %v1781_v27 }
 0x3f1   :  { %1691 = vmatprep.subr.bf16.mxu0 %v1782_v28 }
 0x3f2   :  { %v676_v54 = vadd.f32 %v675_v53, %v674_v52 }
 0x3f4   :  { %v677_v56 = vrot.slane %v676_v54, 2  ;;  %1692 = vmatpush3.bf16.msra.mxu0 %v1782_v28 }
 0x3f5   :  { %1693 = vmatprep.subr.bf16.mxu0 %v1783_v29 }
 0x3f6   :  { %v678_v58 = vadd.f32 %v677_v56, %v676_v54 }
 0x3f8   :  { %v679_v59 = vrot.slane %v678_v58, 1  ;;  %1694 = vmatpush3.bf16.msra.mxu0 %v1783_v29 }
 0x3f9   :  { %1695 = vmatprep.subr.bf16.mxu0 %v1784_v30 }
 0x3fa   :  { %v680_v60 = vadd.f32 %v679_v59, %v678_v58 }
 0x3fc   :  { %v681_v61 = vmul.f32 0.03125, %v680_v60  ;;  %1696 = vmatpush3.bf16.msra.mxu0 %v1784_v30 }
 0x3fd   :  { %1697 = vmatprep.subr.bf16.mxu0 %v1785_v31 }
 0x3fe   :  { %v682_v62 = vadd.f32 1e-05, %v681_v61 }
 0x400   :  { %1807 = vrsqrt.f32 %v682_v62  ;;  %1698 = vmatpush3.bf16.msra.mxu0 %v1785_v31 }
 0x401   :  { %1699 = vmatprep.subr.bf16.mxu0 %v1786_v32 }
 0x404   :  { %1700 = vmatpush3.bf16.msra.mxu0 %v1786_v32 }
 0x40a   :  { %v1808_v0 = vpop.eup %1807 }
 0x40b   :  { %v684_v1 = vmul.f32 %v1808_v0, %v652_v63 }
 0x40d   :  { %v689_v2 = vrot.slane %v684_v1, %v2090_v57 }
 0x40f   :  { %v692_v4 = vmul.f32 %v689_v2, %v665_v40  ;;  %v691_v5 = vmul.f32 %v689_v2, %v664_v39  ;;  %v693_v6 = vmul.f32 %v689_v2, %v666_v41  ;;  %v694_v8 = vmul.f32 %v689_v2, %v667_v42 }
 0x411   :  { %v701_v9 = vadd.f32 %v1507_v3, %v691_v5  ;;  %v702_v10 = vadd.f32 %v1507_v3, %v692_v4  ;;  %v703_v11 = vadd.f32 %v1507_v3, %v693_v6  ;;  %v704_v12 = vadd.f32 %v1507_v3, %v694_v8 }
 0x413   :  { %v705_v13 = vmax.f32 %v701_v9, 0.0  ;;  %v706_v14 = vmax.f32 %v702_v10, 0.0  ;;  %v707_v15 = vmax.f32 %v703_v11, 0.0  ;;  %v708_v16 = vmax.f32 %v704_v12, 0.0 }
 0x415   :  { %v709_v19 = vpack.c.bf16 %v706_v14, %v705_v13  ;;  %v710_v20 = vpack.c.bf16 %v708_v16, %v707_v15  ;;  %v1517_v14 = vld [vmem:[%s2270_s3 + $0x1] sm:$0x1] }
 0x417   :  { %1681 = vmatprep.mubr.bf16.mxu1 %v709_v19 }
 0x418   :  { %1682 = vmatmul.mubr.bf16.vlgmr.msra.gmra.mrb[4].mxu1 %v710_v20  ;;  %v1519_v20 = vld [vmem:[%s2271_s4 + $0x1] ss:$0 sm:$0xff] }
 0x4eb   :  { %v1683_v34 = vpop.f32.mrb[4].mxu1 }
 0x4ec   :  { %v816_v35 = vpop.f32.mrb[5].mxu1  ;;  %v825_v40 = vadd.f32 %v1683_v34, %v1508_v33 }
 0x4ed   :  { %v817_v36 = vadd.f32 %v1508_v33, %v816_v35  ;;  %v1684_v37 = vpop.f32.mrb[6].mxu1 }
 0x4ee   :  { %v819_v39 = vpop.f32.mrb[7].mxu1  ;;  %v828_v45 = vadd.f32 %v1684_v37, %v1508_v33  ;;  %v2173_v48 = vadd.f32 %v825_v40, %v2072_v23  ;;  %v1787_v40 = vld [vmem:[#allocation5 + $0x40] sm:$0xff]  }
 0x4ef   :  { %v820_v41 = vadd.f32 %v1508_v33, %v819_v39  ;;  %v2167_v42 = vadd.f32 %v817_v36, %v2068_v21  ;;  %1705 = vmatprep.subr.bf16.mxu1 %v1787_v40 }
 0x4f0   :  { %v2178_v50 = vadd.f32 %v828_v45, %v2076_v25  ;;  %1706 = vmatpush3.bf16.msra.mxu1 %v1787_v40  ;;  %v1789_v45 = vld [vmem:[#allocation5 + $0x50] sm:$0xff]  }
 0x4f1   :  { %v2170_v46 = vadd.f32 %v820_v41, %v2070_v22  ;;  %v1788_v41 = vld [vmem:[#allocation5 + $0x48] sm:$0xff]  }
 0x4f2   :  { %1707 = vmatprep.subr.bf16.mxu1 %v1788_v41 }
 0x4f3   :  { %v839_v49 = vadd.f32 %v2170_v46, %v2167_v42 }
 0x4f4   :  { %1708 = vmatpush3.bf16.msra.mxu1 %v1788_v41 }
 0x4f5   :  { %v840_v51 = vadd.f32 %v839_v49, %v2173_v48  ;;  %1709 = vmatprep.subr.bf16.mxu1 %v1789_v45  ;;  %v1790_v49 = vld [vmem:[#allocation5 + $0x58] sm:$0xff]  }
 0x4f7   :  { %v841_v52 = vadd.f32 %v840_v51, %v2178_v50 }
 0x4f8   :  { %1710 = vmatpush3.bf16.msra.mxu1 %v1789_v45  ;;  %v1793_v45 = vld [vmem:[#allocation5 + $0x70] sm:$0xff]  }
 0x4f9   :  { %v842_v53 = vrot.slane %v841_v52, 4  ;;  %1711 = vmatprep.subr.bf16.mxu1 %v1790_v49 }
 0x4fb   :  { %v843_v21 = vadd.f32 %v842_v53, %v841_v52  ;;  %v1521_v52 = vld [vmem:[%s2273_s6 + $0x1] ss:$0 sm:$0xff] }
 0x4fc   :  { %1712 = vmatpush3.bf16.msra.mxu1 %v1790_v49 }
 0x4fd   :  { %v844_v54 = vrot.slane %v843_v21, 2 }
 0x4ff   :  { %v845_v56 = vadd.f32 %v844_v54, %v843_v21 }
 0x501   :  { %v846_v58 = vrot.slane %v845_v56, 1 }
 0x503   :  { %v847_v22 = vadd.f32 %v846_v58, %v845_v56 }
 0x505   :  { %v848_v59 = vmul.f32 0.03125, %v847_v22 }
 0x507   :  { %v850_v23 = vsub.f32 %v2170_v46, %v848_v59  ;;  %v849_v60 = vsub.f32 %v2167_v42, %v848_v59  ;;  %v851_v61 = vsub.f32 %v2173_v48, %v848_v59  ;;  %v852_v25 = vsub.f32 %v2178_v50, %v848_v59 }
 0x509   :  { %v854_v62 = vmul.f32 %v850_v23, %v850_v23  ;;  %v853_v63 = vmul.f32 %v849_v60, %v849_v60  ;;  %v855_v0 = vmul.f32 %v851_v61, %v851_v61  ;;  %v856_v2 = vmul.f32 %v852_v25, %v852_v25 }
 0x50b   :  { %v857_v1 = vadd.f32 %v854_v62, %v853_v63 }
 0x50d   :  { %v858_v3 = vadd.f32 %v857_v1, %v855_v0 }
 0x50f   :  { %v859_v4 = vadd.f32 %v858_v3, %v856_v2 }
 0x511   :  { %v860_v5 = vrot.slane %v859_v4, 4 }
 0x513   :  { %v861_v6 = vadd.f32 %v860_v5, %v859_v4 }
 0x515   :  { %v862_v8 = vrot.slane %v861_v6, 2 }
 0x517   :  { %v863_v9 = vadd.f32 %v862_v8, %v861_v6 }
 0x519   :  { %v864_v10 = vrot.slane %v863_v9, 1 }
 0x51b   :  { %v865_v11 = vadd.f32 %v864_v10, %v863_v9 }
 0x51d   :  { %v866_v12 = vmul.f32 0.03125, %v865_v11 }
 0x51f   :  { %v867_v13 = vadd.f32 1e-05, %v866_v12 }
 0x521   :  { %1809 = vrsqrt.f32 %v867_v13 }
 0x52b   :  { %v1810_v15 = vpop.eup %1809 }
 0x52c   :  { %v869_v16 = vmul.f32 %v1810_v15, %v1517_v14 }
 0x52e   :  { %v874_v19 = vrot.slane %v869_v16, %v2090_v57 }
 0x530   :  { %v876_v24 = vmul.f32 %v874_v19, %v849_v60  ;;  %v877_v26 = vmul.f32 %v874_v19, %v850_v23  ;;  %v878_v27 = vmul.f32 %v874_v19, %v851_v61  ;;  %v879_v28 = vmul.f32 %v874_v19, %v852_v25 }
 0x532   :  { %v886_v29 = vadd.f32 %v1519_v20, %v876_v24  ;;  %v887_v30 = vadd.f32 %v1519_v20, %v877_v26  ;;  %v888_v31 = vadd.f32 %v1519_v20, %v878_v27  ;;  %v889_v32 = vadd.f32 %v1519_v20, %v879_v28 }
 0x534   :  { %v890_v33 = vmax.f32 %v886_v29, 0.0  ;;  %v891_v34 = vmax.f32 %v887_v30, 0.0  ;;  %v892_v35 = vmax.f32 %v888_v31, 0.0  ;;  %v893_v36 = vmax.f32 %v889_v32, 0.0  ;;  %v1530_v30 = vld [vmem:[%s2274_s7 + $0x1] sm:$0x1] }
 0x535   :  { %v1791_v31 = vld [vmem:[#allocation5 + $0x60] sm:$0xff]  }
 0x536   :  { %v894_v37 = vpack.c.bf16 %v891_v34, %v890_v33  ;;  %v895_v39 = vpack.c.bf16 %v893_v36, %v892_v35  ;;  %1713 = vmatprep.subr.bf16.mxu1 %v1791_v31  ;;  %v1792_v34 = vld [vmem:[#allocation5 + $0x68] sm:$0xff]   ;;  %v1532_v36 = vld [vmem:[%s2275_s8 + $0x1] ss:$0 sm:$0xff] }
 0x537   :  { %1714 = vmatpush3.bf16.msra.mxu1 %v1791_v31 }
 0x538   :  { %1701 = vmatprep.mubr.bf16.mxu0 %v894_v37  ;;  %1715 = vmatprep.subr.bf16.mxu1 %v1792_v34 }
 0x539   :  { %1702 = vmatmul.mubr.bf16.vlgmr.msra.gmra.mrb[8].mxu0 %v895_v39 }
 0x53b   :  { %1716 = vmatpush3.bf16.msra.mxu1 %v1792_v34  ;;  %v1799_v34 = vld [vmem:[#allocation7 + $0x60] sm:$0xff]  }
 0x53c   :  { %1717 = vmatprep.subr.bf16.mxu1 %v1793_v45 }
 0x53f   :  { %1718 = vmatpush3.bf16.msra.mxu1 %v1793_v45 }
 0x60c   :  { %v1703_v51 = vpop.f32.mrb[8].mxu0 }
 0x60d   :  { %v1003_v53 = vpop.f32.mrb[9].mxu0  ;;  %v1012_v22 = vadd.f32 %v1703_v51, %v1521_v52 }
 0x60e   :  { %v1704_v21 = vpop.f32.mrb[10].mxu0  ;;  %v1004_v56 = vadd.f32 %v1521_v52, %v1003_v53 }
 0x60f   :  { %v1006_v54 = vpop.f32.mrb[11].mxu0  ;;  %v1015_v23 = vadd.f32 %v1704_v21, %v1521_v52 }
 0x610   :  { %v1007_v58 = vadd.f32 %v1521_v52, %v1006_v54 }
 0x612   :  { %v1022_v59 = vadd.f32 %v1007_v58, %v1004_v56 }
 0x614   :  { %v1023_v60 = vadd.f32 %v1022_v59, %v1012_v22 }
 0x616   :  { %v1024_v61 = vadd.f32 %v1023_v60, %v1015_v23 }
 0x618   :  { %v1025_v62 = vrot.slane %v1024_v61, 4 }
 0x61a   :  { %v1026_v25 = vadd.f32 %v1025_v62, %v1024_v61 }
 0x61c   :  { %v1027_v63 = vrot.slane %v1026_v25, 2 }
 0x61e   :  { %v1028_v0 = vadd.f32 %v1027_v63, %v1026_v25 }
 0x620   :  { %v1029_v1 = vrot.slane %v1028_v0, 1 }
 0x622   :  { %v1030_v2 = vadd.f32 %v1029_v1, %v1028_v0 }
 0x624   :  { %v1031_v3 = vmul.f32 0.03125, %v1030_v2 }
 0x626   :  { %v1032_v4 = vsub.f32 %v1004_v56, %v1031_v3  ;;  %v1033_v5 = vsub.f32 %v1007_v58, %v1031_v3  ;;  %v1034_v6 = vsub.f32 %v1012_v22, %v1031_v3  ;;  %v1035_v8 = vsub.f32 %v1015_v23, %v1031_v3  ;;  %v1794_v22 = vld [vmem:[#allocation5 + $0x78] sm:$0xff]  }
 0x627   :  { %1719 = vmatprep.subr.bf16.mxu1 %v1794_v22 }
 0x628   :  { %v1036_v9 = vmul.f32 %v1032_v4, %v1032_v4  ;;  %v1037_v10 = vmul.f32 %v1033_v5, %v1033_v5  ;;  %v1038_v11 = vmul.f32 %v1034_v6, %v1034_v6  ;;  %v1039_v13 = vmul.f32 %v1035_v8, %v1035_v8  ;;  %1720 = vmatpush3.bf16.msra.mxu1 %v1794_v22 }
 0x62a   :  { %v1040_v12 = vadd.f32 %v1037_v10, %v1036_v9 }
 0x62c   :  { %v1041_v14 = vadd.f32 %v1040_v12, %v1038_v11 }
 0x62e   :  { %v1042_v15 = vadd.f32 %v1041_v14, %v1039_v13 }
 0x630   :  { %v1043_v16 = vrot.slane %v1042_v15, 4 }
 0x632   :  { %v1044_v19 = vadd.f32 %v1043_v16, %v1042_v15 }
 0x634   :  { %v1045_v20 = vrot.slane %v1044_v19, 2 }
 0x636   :  { %v1046_v24 = vadd.f32 %v1045_v20, %v1044_v19 }
 0x638   :  { %v1047_v26 = vrot.slane %v1046_v24, 1 }
 0x63a   :  { %v1048_v27 = vadd.f32 %v1047_v26, %v1046_v24 }
 0x63c   :  { %v1049_v28 = vmul.f32 0.03125, %v1048_v27 }
 0x63e   :  { %v1050_v29 = vadd.f32 1e-05, %v1049_v28 }
 0x640   :  { %1811 = vrsqrt.f32 %v1050_v29 }
 0x64a   :  { %v1812_v32 = vpop.eup %1811 }
 0x64b   :  { %v1052_v33 = vmul.f32 %v1812_v32, %v1530_v30  ;;  %v1795_v32 = vld [vmem:[#allocation7 + $0x40] sm:$0xff]  }
 0x64c   :  { %1725 = vmatprep.subr.bf16.mxu0 %v1795_v32 }
 0x64d   :  { %v1057_v35 = vrot.slane %v1052_v33, %v2090_v57  ;;  %1726 = vmatpush3.bf16.msra.mxu0 %v1795_v32  ;;  %v1798_v33 = vld [vmem:[#allocation7 + $0x58] sm:$0xff]  }
 0x64e   :  { %1727 = vmatprep.subr.bf16.mxu0 %v1796_v43 }
 0x64f   :  { %v1060_v37 = vmul.f32 %v1057_v35, %v1033_v5  ;;  %v1059_v39 = vmul.f32 %v1057_v35, %v1032_v4  ;;  %v1062_v40 = vmul.f32 %v1057_v35, %v1035_v8  ;;  %v1061_v41 = vmul.f32 %v1057_v35, %v1034_v6  ;;  %v1800_v35 = vld [vmem:[#allocation7 + $0x68] sm:$0xff]  }
 0x651   :  { %v1070_v49 = vadd.f32 %v1532_v36, %v1060_v37  ;;  %v1069_v51 = vadd.f32 %v1532_v36, %v1059_v39  ;;  %v1072_v52 = vadd.f32 %v1532_v36, %v1062_v40  ;;  %v1071_v53 = vadd.f32 %v1532_v36, %v1061_v41  ;;  %1728 = vmatpush3.bf16.msra.mxu0 %v1796_v43  ;;  %v1801_v36 = vld [vmem:[#allocation7 + $0x70] sm:$0xff]   ;;  %v1802_v37 = vld [vmem:[#allocation7 + $0x78] sm:$0xff]   ;;  %v1534_v40 = vld [vmem:[%s2277_s10 + $0x1] ss:$0 sm:$0xff] }
 0x652   :  { %1729 = vmatprep.subr.bf16.mxu0 %v1797_v47 }
 0x653   :  { %v1074_v21 = vmax.f32 %v1070_v49, 0.0  ;;  %v1073_v54 = vmax.f32 %v1069_v51, 0.0  ;;  %v1076_v56 = vmax.f32 %v1072_v52, 0.0  ;;  %v1075_v58 = vmax.f32 %v1071_v53, 0.0 }
 0x655   :  { %1129 = vrot.lane.b32.xlu1 %v1074_v21, %s1914_s9  ;;  %1127 = vrot.lane.b32.xlu0 %v1073_v54, %s1914_s9  ;;  %v1107_v59 = vrot.slane %v1074_v21, 2  ;;  %v1108_v23 = vrot.slane %v1075_v58, 2  ;;  %v1106_v60 = vrot.slane %v1073_v54, 2  ;;  %v1109_v61 = vrot.slane %v1076_v56, 2 }
 0x656   :  { %v1081_v62 = vrot.slane %v1073_v54, 6  ;;  %v1082_v25 = vrot.slane %v1074_v21, 6  ;;  %v1084_v63 = vrot.slane %v1076_v56, 6  ;;  %v1083_v0 = vrot.slane %v1075_v58, 6  ;;  %1730 = vmatpush3.bf16.msra.mxu0 %v1797_v47 }
 0x657   :  { %v1112_v1 = vsel %vm1110_vm8, %v1107_v59, %v1108_v23  ;;  %v1113_v2 = vsel %vm1110_vm8, %v1106_v60, %v1107_v59  ;;  %v1114_v3 = vsel %vm1110_vm8, %v1109_v61, %v1106_v60  ;;  %v1111_v4 = vsel %vm1110_vm8, %v1108_v23, %v1109_v61  ;;  %1731 = vmatprep.subr.bf16.mxu0 %v1798_v33 }
 0x658   :  { %v1088_v5 = vsel %vm1085_vm9, %v1081_v62, %v1082_v25  ;;  %v1089_v6 = vsel %vm1085_vm9, %v1084_v63, %v1081_v62  ;;  %v1086_v8 = vsel %vm1085_vm9, %v1083_v0, %v1084_v63  ;;  %v1087_v9 = vsel %vm1085_vm9, %v1082_v25, %v1083_v0 }
 0x659   :  { %1133 = vrot.lane.b32.xlu1 %v1076_v56, %s1914_s9  ;;  %1131 = vrot.lane.b32.xlu0 %v1075_v58, %s1914_s9  ;;  %v1124_v10 = vsel %vm1103_vm10, %v1112_v1, 0.0  ;;  %v1126_v11 = vsel %vm1105_vm11, %v1114_v3, 0.0  ;;  %v1098_v14 = vsel %vm1077_vm12, %v1089_v6, 0.0  ;;  %v1100_v24 = vsel %vm1079_vm13, %v1087_v9, 0.0 }
 0x65a   :  { %1732 = vmatpush3.bf16.msra.mxu0 %v1798_v33 }
 0x65b   :  { %1733 = vmatprep.subr.bf16.mxu0 %v1799_v34 }
 0x65d   :  { %1141 = vrot.lane.b32.xlu1 %v1124_v10, %s1915_s19  ;;  %1139 = vrot.lane.b32.xlu0 %v1113_v2, %s1915_s19 }
 0x65e   :  { %1734 = vmatpush3.bf16.msra.mxu0 %v1799_v34 }
 0x65f   :  { %1735 = vmatprep.subr.bf16.mxu0 %v1800_v35 }
 0x661   :  { %1145 = vrot.lane.b32.xlu1 %v1126_v11, %s1915_s19  ;;  %1143 = vrot.lane.b32.xlu0 %v1111_v4, %s1915_s19 }
 0x662   :  { %1736 = vmatpush3.bf16.msra.mxu0 %v1800_v35 }
 0x663   :  { %1737 = vmatprep.subr.bf16.mxu0 %v1801_v36 }
 0x666   :  { %1738 = vmatpush3.bf16.msra.mxu0 %v1801_v36 }
 0x667   :  { %1739 = vmatprep.subr.bf16.mxu0 %v1802_v37 }
 0x66a   :  { %1740 = vmatpush3.bf16.msra.mxu0 %v1802_v37 }
 0x6c7   :  { %v1130_v7 = vpop.permute.xlu1 %1129  ;;  %v1128_v17 = vpop.permute.xlu0 %1127 }
 0x6c8   :  { %v1136_v15 = vadd.f32 %v1130_v7, %v1088_v5  ;;  %v1135_v16 = vadd.f32 %v1128_v17, %v1098_v14 }
 0x6cb   :  { %v1134_v12 = vpop.permute.xlu1 %1133  ;;  %v1132_v13 = vpop.permute.xlu0 %1131 }
 0x6cc   :  { %v1138_v26 = vadd.f32 %v1134_v12, %v1086_v8  ;;  %v1137_v27 = vadd.f32 %v1132_v13, %v1100_v24  ;;  %v1545_v24 = vld [vmem:[%s2279_s12 + $0x1] ss:$0 sm:$0xff]  ;;  %s1916_s12 = smov [#allocation8]  }
 0x6cd   :  { %s1471_s19 = sshll.u32 %s1916_s12, 4  ;;  %s1472_s19 = int_to_ptr.vmem [resolvable:$true] %s1471_s19 }
 0x6ce   :  { %p1886_p11 = scmp.lt.s32.totalorder %s1472_s19, %s1472_s19 }
 0x6cf   :  { %v1142_v18 = vpop.permute.xlu1 %1141  ;;  %v1140_v38 = vpop.permute.xlu0 %1139 }
 0x6d0   :  { %v1148_v19 = vadd.f32 %v1142_v18, %v1136_v15  ;;  %v1147_v20 = vadd.f32 %v1140_v38, %v1135_v16  ;;  %v1543_v18 = vld [vmem:[%s2278_s11 + $0x1] sm:$0x1] }
 0x6d2   :  { %v1151_v28 = vpack.c.bf16 %v1148_v19, %v1147_v20 }
 0x6d3   :  { %v1146_v29 = vpop.permute.xlu1 %1145  ;;  %v1144_v30 = vpop.permute.xlu0 %1143 }
 0x6d4   :  { %v1150_v55 = vadd.f32 %v1146_v29, %v1138_v26  ;;  %v1149_v44 = vadd.f32 %v1144_v30, %v1137_v27  ;;  %1721 = vmatprep.mubr.bf16.mxu1 %v1151_v28 }
 0x6d6   :  { %v1152_v31 = vpack.c.bf16 %v1150_v55, %v1149_v44 }
 0x6d8   :  { %1722 = vmatmul.mubr.bf16.vlgmr.msra.gmra.mrb[8].mxu1 %v1152_v31 }
 0x7ab   :  { %v1723_v39 = vpop.f32.mrb[8].mxu1 }
 0x7ac   :  { %v1260_v41 = vpop.f32.mrb[9].mxu1  ;;  %v1269_v53 = vadd.f32 %v1723_v39, %v1534_v40 }
 0x7ad   :  { %v1724_v45 = vpop.f32.mrb[10].mxu1  ;;  %v1261_v51 = vadd.f32 %v1534_v40, %v1260_v41 }
 0x7ae   :  { %v1263_v49 = vpop.f32.mrb[11].mxu1  ;;  %v1272_v54 = vadd.f32 %v1724_v45, %v1534_v40 }
 0x7af   :  { %v1264_v52 = vadd.f32 %v1534_v40, %v1263_v49 }
 0x7b1   :  { %v1279_v21 = vadd.f32 %v1264_v52, %v1261_v51 }
 0x7b3   :  { %v1280_v56 = vadd.f32 %v1279_v21, %v1269_v53 }
 0x7b5   :  { %v1281_v58 = vadd.f32 %v1280_v56, %v1272_v54 }
 0x7b7   :  { %v1282_v22 = vrot.slane %v1281_v58, 4 }
 0x7b9   :  { %v1283_v59 = vadd.f32 %v1282_v22, %v1281_v58 }
 0x7bb   :  { %v1284_v23 = vrot.slane %v1283_v59, 2 }
 0x7bd   :  { %v1285_v60 = vadd.f32 %v1284_v23, %v1283_v59 }
 0x7bf   :  { %v1286_v61 = vrot.slane %v1285_v60, 1 }
 0x7c1   :  { %v1287_v62 = vadd.f32 %v1286_v61, %v1285_v60 }
 0x7c3   :  { %v1288_v25 = vmul.f32 0.03125, %v1287_v62 }
 0x7c5   :  { %v1289_v63 = vsub.f32 %v1261_v51, %v1288_v25  ;;  %v1290_v0 = vsub.f32 %v1264_v52, %v1288_v25  ;;  %v1291_v1 = vsub.f32 %v1269_v53, %v1288_v25  ;;  %v1292_v2 = vsub.f32 %v1272_v54, %v1288_v25 }
 0x7c7   :  { %v1293_v3 = vmul.f32 %v1289_v63, %v1289_v63  ;;  %v1294_v4 = vmul.f32 %v1290_v0, %v1290_v0  ;;  %v1295_v5 = vmul.f32 %v1291_v1, %v1291_v1  ;;  %v1296_v8 = vmul.f32 %v1292_v2, %v1292_v2 }
 0x7c9   :  { %v1297_v6 = vadd.f32 %v1294_v4, %v1293_v3 }
 0x7cb   :  { %v1298_v9 = vadd.f32 %v1297_v6, %v1295_v5 }
 0x7cd   :  { %v1299_v10 = vadd.f32 %v1298_v9, %v1296_v8 }
 0x7cf   :  { %v1300_v11 = vrot.slane %v1299_v10, 4 }
 0x7d1   :  { %v1301_v7 = vadd.f32 %v1300_v11, %v1299_v10 }
 0x7d3   :  { %v1302_v17 = vrot.slane %v1301_v7, 2 }
 0x7d5   :  { %v1303_v12 = vadd.f32 %v1302_v17, %v1301_v7 }
 0x7d7   :  { %v1304_v13 = vrot.slane %v1303_v12, 1 }
 0x7d9   :  { %v1305_v14 = vadd.f32 %v1304_v13, %v1303_v12 }
 0x7db   :  { %v1306_v15 = vmul.f32 0.03125, %v1305_v14 }
 0x7dd   :  { %v1307_v16 = vadd.f32 1e-05, %v1306_v15 }
 0x7df   :  { %1813 = vrsqrt.f32 %v1307_v16 }
 0x7e9   :  { %v1814_v38 = vpop.eup %1813 }
 0x7ea   :  { %v1309_v19 = vmul.f32 %v1814_v38, %v1543_v18 }
 0x7ec   :  { %v1314_v20 = vrot.slane %v1309_v19, %v2090_v57  ;;  %v1547_v57 = vld [vmem:[%s2281_s14 + $0x1] ss:$0 sm:$0xff]  ;;  %s1881_s14 = scalar_lea.vmem %s1472_s19, 512 }
 0x7ed   :  { %p1882_p10 = scmp.ne.s32.totalorder %s1472_s19, %s1881_s14  ;;  %p1887_p12 = scmp.lt.s32.totalorder %s1881_s14, %s1881_s14 }
 0x7ee   :  { %v1317_v26 = vmul.f32 %v1314_v20, %v1290_v0  ;;  %v1316_v27 = vmul.f32 %v1314_v20, %v1289_v63  ;;  %v1318_v28 = vmul.f32 %v1314_v20, %v1291_v1  ;;  %v1319_v29 = vmul.f32 %v1314_v20, %v1292_v2 }
 0x7ef   :  { %p1888_p13 = por %p1887_p12, %p1886_p11 }
 0x7f0   :  { %v1326_v30 = vadd.f32 %v1545_v24, %v1316_v27  ;;  %v1327_v55 = vadd.f32 %v1545_v24, %v1317_v26  ;;  %v1328_v44 = vadd.f32 %v1545_v24, %v1318_v28  ;;  %v1329_v31 = vadd.f32 %v1545_v24, %v1319_v29 }
 0x7f1   :  { %p1889_p0 = pnand %p1888_p13, %p1882_p10 }
 0x7f2   :  { %v1330_v32 = vmax.f32 %v1326_v30, 0.0  ;;  %v1331_v43 = vmax.f32 %v1327_v55, 0.0  ;;  %v1332_v47 = vmax.f32 %v1328_v44, 0.0  ;;  %v1333_v33 = vmax.f32 %v1329_v31, 0.0 }
 0x7f4   :  { %v1334_v34 = vpack.c.bf16 %v1331_v43, %v1330_v32  ;;  %v1335_v35 = vpack.c.bf16 %v1333_v33, %v1332_v47 }
 0x7f6   :  { %1741 = vmatprep.mubr.bf16.mxu0 %v1334_v34 }
 0x7f7   :  { %1742 = vmatmul.mubr.bf16.vlgmr.msra.gmra.mrb[12].mxu0 %v1335_v35 }
 0x8ca   :  { %v1743_v36 = vpop.f32.mrb[12].mxu0 }
 0x8cb   :  { %v1452_v37 = vadd.f32 %v1743_v36, %v1547_v57  ;;  %v1443_v39 = vpop.f32.mrb[13].mxu0 }
 0x8cc   :  { %v1444_v40 = vadd.f32 %v1547_v57, %v1443_v39  ;;  %v1744_v41 = vpop.f32.mrb[14].mxu0 }
 0x8cd   :  { %v1460_v45 = vadd.f32 %v1452_v37, %v2173_v48  ;;  %v1455_v49 = vadd.f32 %v1744_v41, %v1547_v57  ;;  %v1446_v51 = vpop.f32.mrb[15].mxu0 }
 0x8ce   :  { %v1458_v52 = vadd.f32 %v1444_v40, %v2167_v42  ;;  %v1447_v53 = vadd.f32 %v1547_v57, %v1446_v51 }
 0x8cf   :  { %1464 = vst [vmem:[#allocation8 + $0x10] sm:$0xff] %v1460_v45  ;;  %v1461_v21 = vadd.f32 %v1455_v49, %v2178_v50 }
 0x8d0   :  { %1462 = vst [vmem:[#allocation8] sm:$0xff] %v1458_v52  ;;  %v1459_v54 = vadd.f32 %v1447_v53, %v2170_v46 }
 0x8d1   :  { %1465 = vst [vmem:[#allocation8 + $0x18] sm:$0xff] %v1461_v21 }
 0x8d2   :  { %1463 = vst [vmem:[#allocation8 + $0x8] sm:$0xff] %v1459_v54 }
 0x8d3   :  { %1892 = shalt.err (!%p1889_p0)
}
 0x8d4   :  { %s1893_s20 = scalar_lea.hbm %s2282_s15, 512 }
 0x8d5   :  { %p1894_p1 = scmp.ne.s32.totalorder %s2282_s15, %s1893_s20  ;;  %p1897_p2 = scmp.lt.u32.totalorder %s1893_s20, %s2282_s15 }
 0x8d7   :  { %p1899_p3 = pnand %p1897_p2, %p1894_p1 }
 0x8d9   :  { %1902 = shalt.err (!%p1899_p3)
}
 0x8da   :  { %s1917_s0 = smov 128  }
 0x8db   :  { %1477 = dma.vmem_to_hbm [thread:$0]  %s1472_s19, 512, %s2282_s15, [#allocation4], %s1917_s0, %s1917_s0, %s1914_s9  }
 0x8dc   :  { %1907 = dma.done.wait [#allocation4], 512  }
 0x8dd   :  { %1908 = vsyncadd [#allocation4], 4294966784 }
 0x8de   :  { %1481 = vsyncpa [#allocation3], 1 }
 0x8df   :  { %1482 = vsyncpa [#allocation6], 1 }
 0x8e0   :  { %1483 = vsyncpa [#allocation4], 1 }

</bundles_post_ra>
